<compile_context>
chip_gen: v7x
topology: tpu7x:2x2x1
jax: 0.10.0
libtpu: 0.0.40
codegen_flags: <defaults>
</compile_context>

<pallas_src>
import jax
import jax.numpy as jnp
from jax.experimental import pallas as pl
from jax.experimental.pallas import tpu as pltpu


def _scale_prediction_kernel(x_ref, w1_ref, bias_ref, w2_ref, b2_ref, o_ref,
                             shifted_ref):
    # x_ref      : (1, H, W, Cin)      unpadded NHWC input tile (bf16)
    # w1_ref     : (3, 3, Cin, Cmid)   3x3 conv weights, BN scale folded (bf16)
    # bias_ref   : (1, Cmid)           folded BN bias (f32)
    # w2_ref     : (Cmid, Coutp)       1x1 conv weights, zero-padded cols (bf16)
    # b2_ref     : (1, Coutp)          1x1 conv bias, zero-padded (f32)
    # o_ref      : (1, H, W, Coutp)    output (bf16), Coutp = 128-multiple
    # shifted_ref: (3, H+2, W, Cin)    dw-shifted, zero-haloed input (bf16)
    _, H, W, Cin = x_ref.shape
    _, _, _, Coutp = o_ref.shape

    # --- Halo zeroing (tiny): top/bottom rows of all three planes, leading
    # column of the dw=0 plane, trailing column of the dw=2 plane.  These cells
    # are never touched by the interior writes below, so this is all the
    # zero-fill the scratch ever needs (no full-scratch zero pass).
    zdt = shifted_ref.dtype
    for dw in range(3):
        shifted_ref[dw, 0:1, :, :] = jnp.zeros((1, W, Cin), zdt)
        shifted_ref[dw, H + 1:H + 2, :, :] = jnp.zeros((1, W, Cin), zdt)
    shifted_ref[0, 1:H + 1, 0:1, :] = jnp.zeros((H, 1, Cin), zdt)
    shifted_ref[2, 1:H + 1, W - 1:W, :] = jnp.zeros((H, 1, Cin), zdt)

    # --- Column(dw)-shifted copies of the input tile (interior rows 1..H).
    # Only 2 of the 3 writes are sublane-misaligned; the 9-tap loop below then
    # slices exclusively along the free outer H axis.
    x = x_ref[0]                                            # (H, W, Cin)
    shifted_ref[1, 1:H + 1, :, :] = x                       # dw=1: x[h, w]
    shifted_ref[0, 1:H + 1, 1:W, :] = x[:, 0:W - 1, :]      # dw=0: x[h, w-1]
    shifted_ref[2, 1:H + 1, 0:W - 1, :] = x[:, 1:W, :]      # dw=2: x[h, w+1]
    # TODO(synk): on v5e, build the +/-1 column shifts with pltpu.roll along W
    # plus a one-column mask and store full aligned planes (frees the vst slot).

    # --- 3x3 "same" conv: 9 MXU matmuls accumulated in traced f32 values
    # (single store at the end; no accumulator read-modify-write passes).
    # All ref slices are along leading (untiled) axes; W is a multiple of 8 so
    # the (H, W, Cin) -> (H*W, Cin) reshape stays sublane-aligned.
    acc = None
    for dh in range(3):
        for dw in range(3):
            patch = shifted_ref[dw, dh:dh + H, :, :].reshape(H * W, Cin)
            tap = jnp.dot(patch, w1_ref[dh, dw, :, :],
                          preferred_element_type=jnp.float32)
            acc = tap if acc is None else acc + tap

    # Folded BatchNorm bias + LeakyReLU(0.1).
    a = acc + bias_ref[...]
    a = jnp.maximum(a, 0.1 * a)

    # 1x1 conv (+bias) on the MXU; lane-dense (128-multiple) bf16 output store.
    y = jnp.dot(a.astype(w2_ref.dtype), w2_ref[...],
                preferred_element_type=jnp.float32) + b2_ref[...]
    o_ref[...] = y.reshape(1, H, W, Coutp).astype(o_ref.dtype)


def scale_prediction(x_nchw, w1, gamma, beta, run_mean, run_var, w2, b2,
                     num_classes, eps=1e-5):
    B, Cin, H, W = x_nchw.shape
    Cmid = w1.shape[-1]
    Cout = w2.shape[-1]
    assert Cout == 3 * (num_classes + 5)
    # Sublane alignment keeps the in-kernel (H,W,C)->(H*W,C) reshapes free.
    # TODO(synk): pad W to a multiple of 8 in the wrapper for 13x13/26x26 heads.
    assert H % 8 == 0 and W % 8 == 0
    Coutp = ((Cout + 127) // 128) * 128    # lane-dense output channel count

    # NCHW -> NHWC, bf16 for the MXU.  No spatial pre-padding in HBM: the
    # kernel zero-pads the halo inside a VMEM scratch.
    x_nhwc = jnp.transpose(x_nchw, (0, 2, 3, 1)).astype(jnp.bfloat16)

    # Fold eval-mode BatchNorm into the 3x3 conv: scale goes into the weights,
    # the shift stays as a per-channel bias added after the conv.
    inv_std = 1.0 / jnp.sqrt(run_var.astype(jnp.float32) + eps)
    scale = gamma.astype(jnp.float32) * inv_std                    # (Cmid,)
    bias = (beta.astype(jnp.float32)
            - run_mean.astype(jnp.float32) * scale).reshape(1, Cmid)
    w1f = (w1.astype(jnp.float32) * scale[None, None, None, :]).astype(jnp.bfloat16)

    # Zero-pad the 1x1-conv output channels up to a multiple of 128 so the
    # kernel's store is unmasked; padded columns are zero and sliced off below.
    w2p = jnp.zeros((Cmid, Coutp), jnp.float32).at[:, :Cout].set(
        w2.astype(jnp.float32)).astype(jnp.bfloat16)
    b2p = jnp.zeros((1, Coutp), jnp.float32).at[:, :Cout].set(
        b2.astype(jnp.float32).reshape(1, Cout))

    out_nhwc = pl.pallas_call(
        _scale_prediction_kernel,
        out_shape=jax.ShapeDtypeStruct((B, H, W, Coutp), jnp.bfloat16),
        grid_spec=pltpu.PrefetchScalarGridSpec(
            num_scalar_prefetch=0,
            grid=(B,),
            in_specs=[
                pl.BlockSpec((1, H, W, Cin), lambda b: (b, 0, 0, 0)),
                pl.BlockSpec((3, 3, Cin, Cmid), lambda b: (0, 0, 0, 0)),
                pl.BlockSpec((1, Cmid), lambda b: (0, 0)),
                pl.BlockSpec((Cmid, Coutp), lambda b: (0, 0)),
                pl.BlockSpec((1, Coutp), lambda b: (0, 0)),
            ],
            out_specs=pl.BlockSpec((1, H, W, Coutp), lambda b: (b, 0, 0, 0)),
            scratch_shapes=[
                pltpu.VMEM((3, H + 2, W, Cin), jnp.bfloat16),   # shifted input
            ],
        ),
        compiler_params=pltpu.CompilerParams(
            dimension_semantics=("parallel",),          # batch elems independent
            vmem_limit_bytes=32 * 1024 * 1024,
        ),
    )(x_nhwc, w1f, bias, w2p, b2p)

    # PyTorch: (B, 3*(nc+5), H, W).reshape(B,3,nc+5,H,W).permute(0,1,3,4,2)
    # In NHWC: (B,H,W,Coutp) -> drop pad, back to f32 -> (B,H,W,3,nc+5)
    #          -> (B,3,H,W,nc+5).
    out = out_nhwc[..., :Cout].astype(jnp.float32)
    out = out.reshape(B, H, W, 3, num_classes + 5)
    return jnp.transpose(out, (0, 3, 1, 2, 4))


def _reference(x_nchw, w1, gamma, beta, run_mean, run_var, w2, b2,
               num_classes, eps=1e-5):
    """Pure-JAX f32 reference (same math, no Pallas)."""
    x = jnp.transpose(x_nchw, (0, 2, 3, 1))
    B, H, W, Cin = x.shape
    Cmid = w1.shape[-1]
    xpad = jnp.pad(x, ((0, 0), (1, 1), (1, 1), (0, 0)))
    y1 = jnp.zeros((B, H, W, Cmid), jnp.float32)
    for dh in range(3):
        for dw in range(3):
            y1 = y1 + jnp.einsum('bhwc,cd->bhwd',
                                 xpad[:, dh:dh + H, dw:dw + W, :], w1[dh, dw])
    a = (y1 - run_mean) / jnp.sqrt(run_var + eps) * gamma + beta
    a = jnp.where(a > 0, a, 0.1 * a)
    y2 = jnp.einsum('bhwc,cd->bhwd', a, w2) + b2
    out = y2.reshape(B, H, W, 3, num_classes + 5)
    return jnp.transpose(out, (0, 3, 1, 2, 4))


if __name__ == "__main__":
    # Small shapes consistent with the module.
    B, Cin, H, W = 2, 4, 16, 16
    num_classes = 3
    Cmid = 2 * Cin                    # 8
    Cout = 3 * (num_classes + 5)      # 24

    key = jax.random.PRNGKey(0)
    kx, k1, k2, k3, kg, kb, km, kv = jax.random.split(key, 8)

    x = jax.random.normal(kx, (B, Cin, H, W), jnp.float32)
    # Conv1: 3x3, bias=False (HWIO layout)
    w1 = jax.random.normal(k1, (3, 3, Cin, Cmid), jnp.float32) * 0.1
    # BatchNorm params + running stats (deterministic synthetic values)
    gamma = 1.0 + 0.1 * jax.random.normal(kg, (Cmid,), jnp.float32)
    beta = 0.1 * jax.random.normal(kb, (Cmid,), jnp.float32)
    run_mean = 0.1 * jax.random.normal(km, (Cmid,), jnp.float32)
    run_var = 1.0 + 0.1 * jax.random.uniform(kv, (Cmid,), jnp.float32)
    # Conv2: 1x1, bias=True
    w2 = jax.random.normal(k2, (Cmid, Cout), jnp.float32) * 0.1
    b2 = jax.random.normal(k3, (Cout,), jnp.float32) * 0.1

    out = scale_prediction(x, w1, gamma, beta, run_mean, run_var, w2, b2,
                           num_classes)
    out = jax.block_until_ready(out)

    ref = _reference(x, w1, gamma, beta, run_mean, run_var, w2, b2, num_classes)
    assert out.shape == (B, 3, H, W, num_classes + 5), out.shape
    # bf16 MXU operands + bf16 output (f32 accumulation) -> relaxed tolerance.
    assert jnp.allclose(out, ref, atol=2e-2, rtol=2e-2), \
        float(jnp.max(jnp.abs(out - ref)))

    print("KERNEL_OK")
</pallas_src>

<mosaic_0001>
module attributes {stable_mosaic.version = 11 : i64} {
  func.func @_scale_prediction_kernel(%arg0: i32, %arg1: memref<1x16x16x4xbf16, #tpu.memory_space<vmem>>, %arg2: memref<3x3x4x8xbf16, #tpu.memory_space<vmem>>, %arg3: memref<1x8xf32, #tpu.memory_space<vmem>>, %arg4: memref<8x128xbf16, #tpu.memory_space<vmem>>, %arg5: memref<1x128xf32, #tpu.memory_space<vmem>>, %arg6: memref<1x16x16x128xbf16, #tpu.memory_space<vmem>>, %arg7: memref<3x18x16x4xbf16, #tpu.memory_space<vmem>>) attributes {dimension_semantics = [#tpu.dimension_semantics<parallel>], iteration_bounds = array<i64: 2>, scalar_prefetch = 0 : i64, scratch_operands = 1 : i64, tpu.core_type = #tpu.core_type<tc>, window_params = [{transform_indices = @transform_0, window_bounds = array<i64: 1, 16, 16, 4>}, {pipeline_mode = #tpu.pipeline_mode<synchronous>, transform_indices = @transform_1, window_bounds = array<i64: 3, 3, 4, 8>}, {pipeline_mode = #tpu.pipeline_mode<synchronous>, transform_indices = @transform_2, window_bounds = array<i64: 1, 8>}, {pipeline_mode = #tpu.pipeline_mode<synchronous>, transform_indices = @transform_3, window_bounds = array<i64: 8, 128>}, {pipeline_mode = #tpu.pipeline_mode<synchronous>, transform_indices = @transform_4, window_bounds = array<i64: 1, 128>}, {transform_indices = @transform_5, window_bounds = array<i64: 1, 16, 16, 128>}]} {
    %cst = arith.constant 0.000000e+00 : bf16
    %0 = vector.broadcast %cst : bf16 to vector<1x16x4xbf16>
    %c0 = arith.constant 0 : index
    %c0_0 = arith.constant 0 : index
    %c0_1 = arith.constant 0 : index
    %c0_2 = arith.constant 0 : index
    %1 = vector.load %arg7[%c0, %c0_0, %c0_1, %c0_2] : memref<3x18x16x4xbf16, #tpu.memory_space<vmem>>, vector<1x1x16x4xbf16>
    %2 = vector.shape_cast %1 : vector<1x1x16x4xbf16> to vector<1x16x4xbf16>
    %3 = vector.shape_cast %0 : vector<1x16x4xbf16> to vector<1x1x16x4xbf16>
    tpu.vector_store %arg7[%c0, %c0_0, %c0_1, %c0_2], %3 {strides = array<i32>} : memref<3x18x16x4xbf16, #tpu.memory_space<vmem>>, vector<1x1x16x4xbf16>,
    %cst_3 = arith.constant 0.000000e+00 : bf16
    %4 = vector.broadcast %cst_3 : bf16 to vector<1x16x4xbf16>
    %c0_4 = arith.constant 0 : index
    %c17 = arith.constant 17 : index
    %c0_5 = arith.constant 0 : index
    %c0_6 = arith.constant 0 : index
    %5 = vector.load %arg7[%c0_4, %c17, %c0_5, %c0_6] : memref<3x18x16x4xbf16, #tpu.memory_space<vmem>>, vector<1x1x16x4xbf16>
    %6 = vector.shape_cast %5 : vector<1x1x16x4xbf16> to vector<1x16x4xbf16>
    %7 = vector.shape_cast %4 : vector<1x16x4xbf16> to vector<1x1x16x4xbf16>
    tpu.vector_store %arg7[%c0_4, %c17, %c0_5, %c0_6], %7 {strides = array<i32>} : memref<3x18x16x4xbf16, #tpu.memory_space<vmem>>, vector<1x1x16x4xbf16>,
    %cst_7 = arith.constant 0.000000e+00 : bf16
    %8 = vector.broadcast %cst_7 : bf16 to vector<1x16x4xbf16>
    %c1 = arith.constant 1 : index
    %c0_8 = arith.constant 0 : index
    %c0_9 = arith.constant 0 : index
    %c0_10 = arith.constant 0 : index
    %9 = vector.load %arg7[%c1, %c0_8, %c0_9, %c0_10] : memref<3x18x16x4xbf16, #tpu.memory_space<vmem>>, vector<1x1x16x4xbf16>
    %10 = vector.shape_cast %9 : vector<1x1x16x4xbf16> to vector<1x16x4xbf16>
    %11 = vector.shape_cast %8 : vector<1x16x4xbf16> to vector<1x1x16x4xbf16>
    tpu.vector_store %arg7[%c1, %c0_8, %c0_9, %c0_10], %11 {strides = array<i32>} : memref<3x18x16x4xbf16, #tpu.memory_space<vmem>>, vector<1x1x16x4xbf16>,
    %cst_11 = arith.constant 0.000000e+00 : bf16
    %12 = vector.broadcast %cst_11 : bf16 to vector<1x16x4xbf16>
    %c1_12 = arith.constant 1 : index
    %c17_13 = arith.constant 17 : index
    %c0_14 = arith.constant 0 : index
    %c0_15 = arith.constant 0 : index
    %13 = vector.load %arg7[%c1_12, %c17_13, %c0_14, %c0_15] : memref<3x18x16x4xbf16, #tpu.memory_space<vmem>>, vector<1x1x16x4xbf16>
    %14 = vector.shape_cast %13 : vector<1x1x16x4xbf16> to vector<1x16x4xbf16>
    %15 = vector.shape_cast %12 : vector<1x16x4xbf16> to vector<1x1x16x4xbf16>
    tpu.vector_store %arg7[%c1_12, %c17_13, %c0_14, %c0_15], %15 {strides = array<i32>} : memref<3x18x16x4xbf16, #tpu.memory_space<vmem>>, vector<1x1x16x4xbf16>,
    %cst_16 = arith.constant 0.000000e+00 : bf16
    %16 = vector.broadcast %cst_16 : bf16 to vector<1x16x4xbf16>
    %c2 = arith.constant 2 : index
    %c0_17 = arith.constant 0 : index
    %c0_18 = arith.constant 0 : index
    %c0_19 = arith.constant 0 : index
    %17 = vector.load %arg7[%c2, %c0_17, %c0_18, %c0_19] : memref<3x18x16x4xbf16, #tpu.memory_space<vmem>>, vector<1x1x16x4xbf16>
    %18 = vector.shape_cast %17 : vector<1x1x16x4xbf16> to vector<1x16x4xbf16>
    %19 = vector.shape_cast %16 : vector<1x16x4xbf16> to vector<1x1x16x4xbf16>
    tpu.vector_store %arg7[%c2, %c0_17, %c0_18, %c0_19], %19 {strides = array<i32>} : memref<3x18x16x4xbf16, #tpu.memory_space<vmem>>, vector<1x1x16x4xbf16>,
    %cst_20 = arith.constant 0.000000e+00 : bf16
    %20 = vector.broadcast %cst_20 : bf16 to vector<1x16x4xbf16>
    %c2_21 = arith.constant 2 : index
    %c17_22 = arith.constant 17 : index
    %c0_23 = arith.constant 0 : index
    %c0_24 = arith.constant 0 : index
    %21 = vector.load %arg7[%c2_21, %c17_22, %c0_23, %c0_24] : memref<3x18x16x4xbf16, #tpu.memory_space<vmem>>, vector<1x1x16x4xbf16>
    %22 = vector.shape_cast %21 : vector<1x1x16x4xbf16> to vector<1x16x4xbf16>
    %23 = vector.shape_cast %20 : vector<1x16x4xbf16> to vector<1x1x16x4xbf16>
    tpu.vector_store %arg7[%c2_21, %c17_22, %c0_23, %c0_24], %23 {strides = array<i32>} : memref<3x18x16x4xbf16, #tpu.memory_space<vmem>>, vector<1x1x16x4xbf16>,
    %cst_25 = arith.constant 0.000000e+00 : bf16
    %24 = vector.broadcast %cst_25 : bf16 to vector<16x1x4xbf16>
    %c0_26 = arith.constant 0 : index
    %c1_27 = arith.constant 1 : index
    %c0_28 = arith.constant 0 : index
    %c0_29 = arith.constant 0 : index
    %25 = vector.load %arg7[%c0_26, %c1_27, %c0_28, %c0_29] : memref<3x18x16x4xbf16, #tpu.memory_space<vmem>>, vector<1x16x1x4xbf16>
    %26 = vector.shape_cast %25 : vector<1x16x1x4xbf16> to vector<16x1x4xbf16>
    %27 = vector.shape_cast %24 : vector<16x1x4xbf16> to vector<1x16x1x4xbf16>
    tpu.vector_store %arg7[%c0_26, %c1_27, %c0_28, %c0_29], %27 {strides = array<i32>} : memref<3x18x16x4xbf16, #tpu.memory_space<vmem>>, vector<1x16x1x4xbf16>,
    %cst_30 = arith.constant 0.000000e+00 : bf16
    %28 = vector.broadcast %cst_30 : bf16 to vector<16x1x4xbf16>
    %c2_31 = arith.constant 2 : index
    %c1_32 = arith.constant 1 : index
    %c15 = arith.constant 15 : index
    %c0_33 = arith.constant 0 : index
    %29 = vector.load %arg7[%c2_31, %c1_32, %c15, %c0_33] : memref<3x18x16x4xbf16, #tpu.memory_space<vmem>>, vector<1x16x1x4xbf16>
    %30 = vector.shape_cast %29 : vector<1x16x1x4xbf16> to vector<16x1x4xbf16>
    %31 = vector.shape_cast %28 : vector<16x1x4xbf16> to vector<1x16x1x4xbf16>
    tpu.vector_store %arg7[%c2_31, %c1_32, %c15, %c0_33], %31 {strides = array<i32>} : memref<3x18x16x4xbf16, #tpu.memory_space<vmem>>, vector<1x16x1x4xbf16>,
    %c0_34 = arith.constant 0 : index
    %c0_35 = arith.constant 0 : index
    %c0_36 = arith.constant 0 : index
    %c0_37 = arith.constant 0 : index
    %32 = vector.load %arg1[%c0_34, %c0_35, %c0_36, %c0_37] : memref<1x16x16x4xbf16, #tpu.memory_space<vmem>>, vector<1x16x16x4xbf16>
    %33 = vector.shape_cast %32 : vector<1x16x16x4xbf16> to vector<16x16x4xbf16>
    %c1_38 = arith.constant 1 : index
    %c1_39 = arith.constant 1 : index
    %c0_40 = arith.constant 0 : index
    %c0_41 = arith.constant 0 : index
    %34 = vector.load %arg7[%c1_38, %c1_39, %c0_40, %c0_41] : memref<3x18x16x4xbf16, #tpu.memory_space<vmem>>, vector<1x16x16x4xbf16>
    %35 = vector.shape_cast %34 : vector<1x16x16x4xbf16> to vector<16x16x4xbf16>
    %36 = vector.shape_cast %33 : vector<16x16x4xbf16> to vector<1x16x16x4xbf16>
    tpu.vector_store %arg7[%c1_38, %c1_39, %c0_40, %c0_41], %36 {strides = array<i32>} : memref<3x18x16x4xbf16, #tpu.memory_space<vmem>>, vector<1x16x16x4xbf16>,
    %37 = vector.extract_strided_slice %33 {offsets = [0, 0, 0], sizes = [16, 15, 4], strides = [1, 1, 1]} : vector<16x16x4xbf16> to vector<16x15x4xbf16>
    %c0_42 = arith.constant 0 : index
    %c1_43 = arith.constant 1 : index
    %c1_44 = arith.constant 1 : index
    %c0_45 = arith.constant 0 : index
    %38 = vector.load %arg7[%c0_42, %c1_43, %c1_44, %c0_45] : memref<3x18x16x4xbf16, #tpu.memory_space<vmem>>, vector<1x16x15x4xbf16>
    %39 = vector.shape_cast %38 : vector<1x16x15x4xbf16> to vector<16x15x4xbf16>
    %40 = vector.shape_cast %37 : vector<16x15x4xbf16> to vector<1x16x15x4xbf16>
    tpu.vector_store %arg7[%c0_42, %c1_43, %c1_44, %c0_45], %40 {strides = array<i32>} : memref<3x18x16x4xbf16, #tpu.memory_space<vmem>>, vector<1x16x15x4xbf16>,
    %41 = vector.extract_strided_slice %33 {offsets = [0, 1, 0], sizes = [16, 15, 4], strides = [1, 1, 1]} : vector<16x16x4xbf16> to vector<16x15x4xbf16>
    %c2_46 = arith.constant 2 : index
    %c1_47 = arith.constant 1 : index
    %c0_48 = arith.constant 0 : index
    %c0_49 = arith.constant 0 : index
    %42 = vector.load %arg7[%c2_46, %c1_47, %c0_48, %c0_49] : memref<3x18x16x4xbf16, #tpu.memory_space<vmem>>, vector<1x16x15x4xbf16>
    %43 = vector.shape_cast %42 : vector<1x16x15x4xbf16> to vector<16x15x4xbf16>
    %44 = vector.shape_cast %41 : vector<16x15x4xbf16> to vector<1x16x15x4xbf16>
    tpu.vector_store %arg7[%c2_46, %c1_47, %c0_48, %c0_49], %44 {strides = array<i32>} : memref<3x18x16x4xbf16, #tpu.memory_space<vmem>>, vector<1x16x15x4xbf16>,
    %c0_50 = arith.constant 0 : index
    %c0_51 = arith.constant 0 : index
    %c0_52 = arith.constant 0 : index
    %c0_53 = arith.constant 0 : index
    %45 = vector.load %arg7[%c0_50, %c0_51, %c0_52, %c0_53] : memref<3x18x16x4xbf16, #tpu.memory_space<vmem>>, vector<1x16x16x4xbf16>
    %46 = vector.shape_cast %45 : vector<1x16x16x4xbf16> to vector<16x16x4xbf16>
    %47 = vector.shape_cast %46 : vector<16x16x4xbf16> to vector<256x4xbf16>
    %c0_54 = arith.constant 0 : index
    %c0_55 = arith.constant 0 : index
    %c0_56 = arith.constant 0 : index
    %c0_57 = arith.constant 0 : index
    %48 = vector.load %arg2[%c0_54, %c0_55, %c0_56, %c0_57] : memref<3x3x4x8xbf16, #tpu.memory_space<vmem>>, vector<1x1x4x8xbf16>
    %49 = vector.shape_cast %48 : vector<1x1x4x8xbf16> to vector<4x8xbf16>
    %cst_58 = arith.constant dense<0.000000e+00> : vector<256x8xf32>
    %50 = tpu.matmul %47, %49, %cst_58 {dimension_numbers = #tpu.dot_dimension_numbers<[1], [0], [0], [1], [0, 0, 1, 1], [], []>} : vector<256x4xbf16>, vector<4x8xbf16>, vector<256x8xf32> -> vector<256x8xf32>
    %c1_59 = arith.constant 1 : index
    %c0_60 = arith.constant 0 : index
    %c0_61 = arith.constant 0 : index
    %c0_62 = arith.constant 0 : index
    %51 = vector.load %arg7[%c1_59, %c0_60, %c0_61, %c0_62] : memref<3x18x16x4xbf16, #tpu.memory_space<vmem>>, vector<1x16x16x4xbf16>
    %52 = vector.shape_cast %51 : vector<1x16x16x4xbf16> to vector<16x16x4xbf16>
    %53 = vector.shape_cast %52 : vector<16x16x4xbf16> to vector<256x4xbf16>
    %c0_63 = arith.constant 0 : index
    %c1_64 = arith.constant 1 : index
    %c0_65 = arith.constant 0 : index
    %c0_66 = arith.constant 0 : index
    %54 = vector.load %arg2[%c0_63, %c1_64, %c0_65, %c0_66] : memref<3x3x4x8xbf16, #tpu.memory_space<vmem>>, vector<1x1x4x8xbf16>
    %55 = vector.shape_cast %54 : vector<1x1x4x8xbf16> to vector<4x8xbf16>
    %cst_67 = arith.constant dense<0.000000e+00> : vector<256x8xf32>
    %56 = tpu.matmul %53, %55, %cst_67 {dimension_numbers = #tpu.dot_dimension_numbers<[1], [0], [0], [1], [0, 0, 1, 1], [], []>} : vector<256x4xbf16>, vector<4x8xbf16>, vector<256x8xf32> -> vector<256x8xf32>
    %57 = arith.addf %50, %56 : vector<256x8xf32>
    %c2_68 = arith.constant 2 : index
    %c0_69 = arith.constant 0 : index
    %c0_70 = arith.constant 0 : index
    %c0_71 = arith.constant 0 : index
    %58 = vector.load %arg7[%c2_68, %c0_69, %c0_70, %c0_71] : memref<3x18x16x4xbf16, #tpu.memory_space<vmem>>, vector<1x16x16x4xbf16>
    %59 = vector.shape_cast %58 : vector<1x16x16x4xbf16> to vector<16x16x4xbf16>
    %60 = vector.shape_cast %59 : vector<16x16x4xbf16> to vector<256x4xbf16>
    %c0_72 = arith.constant 0 : index
    %c2_73 = arith.constant 2 : index
    %c0_74 = arith.constant 0 : index
    %c0_75 = arith.constant 0 : index
    %61 = vector.load %arg2[%c0_72, %c2_73, %c0_74, %c0_75] : memref<3x3x4x8xbf16, #tpu.memory_space<vmem>>, vector<1x1x4x8xbf16>
    %62 = vector.shape_cast %61 : vector<1x1x4x8xbf16> to vector<4x8xbf16>
    %cst_76 = arith.constant dense<0.000000e+00> : vector<256x8xf32>
    %63 = tpu.matmul %60, %62, %cst_76 {dimension_numbers = #tpu.dot_dimension_numbers<[1], [0], [0], [1], [0, 0, 1, 1], [], []>} : vector<256x4xbf16>, vector<4x8xbf16>, vector<256x8xf32> -> vector<256x8xf32>
    %64 = arith.addf %57, %63 : vector<256x8xf32>
    %c0_77 = arith.constant 0 : index
    %c1_78 = arith.constant 1 : index
    %c0_79 = arith.constant 0 : index
    %c0_80 = arith.constant 0 : index
    %65 = vector.load %arg7[%c0_77, %c1_78, %c0_79, %c0_80] : memref<3x18x16x4xbf16, #tpu.memory_space<vmem>>, vector<1x16x16x4xbf16>
    %66 = vector.shape_cast %65 : vector<1x16x16x4xbf16> to vector<16x16x4xbf16>
    %67 = vector.shape_cast %66 : vector<16x16x4xbf16> to vector<256x4xbf16>
    %c1_81 = arith.constant 1 : index
    %c0_82 = arith.constant 0 : index
    %c0_83 = arith.constant 0 : index
    %c0_84 = arith.constant 0 : index
    %68 = vector.load %arg2[%c1_81, %c0_82, %c0_83, %c0_84] : memref<3x3x4x8xbf16, #tpu.memory_space<vmem>>, vector<1x1x4x8xbf16>
    %69 = vector.shape_cast %68 : vector<1x1x4x8xbf16> to vector<4x8xbf16>
    %cst_85 = arith.constant dense<0.000000e+00> : vector<256x8xf32>
    %70 = tpu.matmul %67, %69, %cst_85 {dimension_numbers = #tpu.dot_dimension_numbers<[1], [0], [0], [1], [0, 0, 1, 1], [], []>} : vector<256x4xbf16>, vector<4x8xbf16>, vector<256x8xf32> -> vector<256x8xf32>
    %71 = arith.addf %64, %70 : vector<256x8xf32>
    %c1_86 = arith.constant 1 : index
    %c1_87 = arith.constant 1 : index
    %c0_88 = arith.constant 0 : index
    %c0_89 = arith.constant 0 : index
    %72 = vector.load %arg7[%c1_86, %c1_87, %c0_88, %c0_89] : memref<3x18x16x4xbf16, #tpu.memory_space<vmem>>, vector<1x16x16x4xbf16>
    %73 = vector.shape_cast %72 : vector<1x16x16x4xbf16> to vector<16x16x4xbf16>
    %74 = vector.shape_cast %73 : vector<16x16x4xbf16> to vector<256x4xbf16>
    %c1_90 = arith.constant 1 : index
    %c1_91 = arith.constant 1 : index
    %c0_92 = arith.constant 0 : index
    %c0_93 = arith.constant 0 : index
    %75 = vector.load %arg2[%c1_90, %c1_91, %c0_92, %c0_93] : memref<3x3x4x8xbf16, #tpu.memory_space<vmem>>, vector<1x1x4x8xbf16>
    %76 = vector.shape_cast %75 : vector<1x1x4x8xbf16> to vector<4x8xbf16>
    %cst_94 = arith.constant dense<0.000000e+00> : vector<256x8xf32>
    %77 = tpu.matmul %74, %76, %cst_94 {dimension_numbers = #tpu.dot_dimension_numbers<[1], [0], [0], [1], [0, 0, 1, 1], [], []>} : vector<256x4xbf16>, vector<4x8xbf16>, vector<256x8xf32> -> vector<256x8xf32>
    %78 = arith.addf %71, %77 : vector<256x8xf32>
    %c2_95 = arith.constant 2 : index
    %c1_96 = arith.constant 1 : index
    %c0_97 = arith.constant 0 : index
    %c0_98 = arith.constant 0 : index
    %79 = vector.load %arg7[%c2_95, %c1_96, %c0_97, %c0_98] : memref<3x18x16x4xbf16, #tpu.memory_space<vmem>>, vector<1x16x16x4xbf16>
    %80 = vector.shape_cast %79 : vector<1x16x16x4xbf16> to vector<16x16x4xbf16>
    %81 = vector.shape_cast %80 : vector<16x16x4xbf16> to vector<256x4xbf16>
    %c1_99 = arith.constant 1 : index
    %c2_100 = arith.constant 2 : index
    %c0_101 = arith.constant 0 : index
    %c0_102 = arith.constant 0 : index
    %82 = vector.load %arg2[%c1_99, %c2_100, %c0_101, %c0_102] : memref<3x3x4x8xbf16, #tpu.memory_space<vmem>>, vector<1x1x4x8xbf16>
    %83 = vector.shape_cast %82 : vector<1x1x4x8xbf16> to vector<4x8xbf16>
    %cst_103 = arith.constant dense<0.000000e+00> : vector<256x8xf32>
    %84 = tpu.matmul %81, %83, %cst_103 {dimension_numbers = #tpu.dot_dimension_numbers<[1], [0], [0], [1], [0, 0, 1, 1], [], []>} : vector<256x4xbf16>, vector<4x8xbf16>, vector<256x8xf32> -> vector<256x8xf32>
    %85 = arith.addf %78, %84 : vector<256x8xf32>
    %c0_104 = arith.constant 0 : index
    %c2_105 = arith.constant 2 : index
    %c0_106 = arith.constant 0 : index
    %c0_107 = arith.constant 0 : index
    %86 = vector.load %arg7[%c0_104, %c2_105, %c0_106, %c0_107] : memref<3x18x16x4xbf16, #tpu.memory_space<vmem>>, vector<1x16x16x4xbf16>
    %87 = vector.shape_cast %86 : vector<1x16x16x4xbf16> to vector<16x16x4xbf16>
    %88 = vector.shape_cast %87 : vector<16x16x4xbf16> to vector<256x4xbf16>
    %c2_108 = arith.constant 2 : index
    %c0_109 = arith.constant 0 : index
    %c0_110 = arith.constant 0 : index
    %c0_111 = arith.constant 0 : index
    %89 = vector.load %arg2[%c2_108, %c0_109, %c0_110, %c0_111] : memref<3x3x4x8xbf16, #tpu.memory_space<vmem>>, vector<1x1x4x8xbf16>
    %90 = vector.shape_cast %89 : vector<1x1x4x8xbf16> to vector<4x8xbf16>
    %cst_112 = arith.constant dense<0.000000e+00> : vector<256x8xf32>
    %91 = tpu.matmul %88, %90, %cst_112 {dimension_numbers = #tpu.dot_dimension_numbers<[1], [0], [0], [1], [0, 0, 1, 1], [], []>} : vector<256x4xbf16>, vector<4x8xbf16>, vector<256x8xf32> -> vector<256x8xf32>
    %92 = arith.addf %85, %91 : vector<256x8xf32>
    %c1_113 = arith.constant 1 : index
    %c2_114 = arith.constant 2 : index
    %c0_115 = arith.constant 0 : index
    %c0_116 = arith.constant 0 : index
    %93 = vector.load %arg7[%c1_113, %c2_114, %c0_115, %c0_116] : memref<3x18x16x4xbf16, #tpu.memory_space<vmem>>, vector<1x16x16x4xbf16>
    %94 = vector.shape_cast %93 : vector<1x16x16x4xbf16> to vector<16x16x4xbf16>
    %95 = vector.shape_cast %94 : vector<16x16x4xbf16> to vector<256x4xbf16>
    %c2_117 = arith.constant 2 : index
    %c1_118 = arith.constant 1 : index
    %c0_119 = arith.constant 0 : index
    %c0_120 = arith.constant 0 : index
    %96 = vector.load %arg2[%c2_117, %c1_118, %c0_119, %c0_120] : memref<3x3x4x8xbf16, #tpu.memory_space<vmem>>, vector<1x1x4x8xbf16>
    %97 = vector.shape_cast %96 : vector<1x1x4x8xbf16> to vector<4x8xbf16>
    %cst_121 = arith.constant dense<0.000000e+00> : vector<256x8xf32>
    %98 = tpu.matmul %95, %97, %cst_121 {dimension_numbers = #tpu.dot_dimension_numbers<[1], [0], [0], [1], [0, 0, 1, 1], [], []>} : vector<256x4xbf16>, vector<4x8xbf16>, vector<256x8xf32> -> vector<256x8xf32>
    %99 = arith.addf %92, %98 : vector<256x8xf32>
    %c2_122 = arith.constant 2 : index
    %c2_123 = arith.constant 2 : index
    %c0_124 = arith.constant 0 : index
    %c0_125 = arith.constant 0 : index
    %100 = vector.load %arg7[%c2_122, %c2_123, %c0_124, %c0_125] : memref<3x18x16x4xbf16, #tpu.memory_space<vmem>>, vector<1x16x16x4xbf16>
    %101 = vector.shape_cast %100 : vector<1x16x16x4xbf16> to vector<16x16x4xbf16>
    %102 = vector.shape_cast %101 : vector<16x16x4xbf16> to vector<256x4xbf16>
    %c2_126 = arith.constant 2 : index
    %c2_127 = arith.constant 2 : index
    %c0_128 = arith.constant 0 : index
    %c0_129 = arith.constant 0 : index
    %103 = vector.load %arg2[%c2_126, %c2_127, %c0_128, %c0_129] : memref<3x3x4x8xbf16, #tpu.memory_space<vmem>>, vector<1x1x4x8xbf16>
    %104 = vector.shape_cast %103 : vector<1x1x4x8xbf16> to vector<4x8xbf16>
    %cst_130 = arith.constant dense<0.000000e+00> : vector<256x8xf32>
    %105 = tpu.matmul %102, %104, %cst_130 {dimension_numbers = #tpu.dot_dimension_numbers<[1], [0], [0], [1], [0, 0, 1, 1], [], []>} : vector<256x4xbf16>, vector<4x8xbf16>, vector<256x8xf32> -> vector<256x8xf32>
    %106 = arith.addf %99, %105 : vector<256x8xf32>
    %c0_131 = arith.constant 0 : index
    %c0_132 = arith.constant 0 : index
    %107 = vector.load %arg3[%c0_131, %c0_132] : memref<1x8xf32, #tpu.memory_space<vmem>>, vector<1x8xf32>
    %108 = vector.broadcast %107 : vector<1x8xf32> to vector<256x8xf32>
    %109 = arith.addf %106, %108 : vector<256x8xf32>
    %cst_133 = arith.constant 1.000000e-01 : f32
    %110 = vector.broadcast %cst_133 : f32 to vector<256x8xf32>
    %111 = arith.mulf %110, %109 : vector<256x8xf32>
    %112 = arith.maximumf %109, %111 : vector<256x8xf32>
    %113 = arith.truncf %112 : vector<256x8xf32> to vector<256x8xbf16>
    %c0_134 = arith.constant 0 : index
    %c0_135 = arith.constant 0 : index
    %114 = vector.load %arg4[%c0_134, %c0_135] : memref<8x128xbf16, #tpu.memory_space<vmem>>, vector<8x128xbf16>
    %cst_136 = arith.constant dense<0.000000e+00> : vector<256x128xf32>
    %115 = tpu.matmul %113, %114, %cst_136 {dimension_numbers = #tpu.dot_dimension_numbers<[1], [0], [0], [1], [0, 0, 1, 1], [], []>} : vector<256x8xbf16>, vector<8x128xbf16>, vector<256x128xf32> -> vector<256x128xf32>
    %c0_137 = arith.constant 0 : index
    %c0_138 = arith.constant 0 : index
    %116 = vector.load %arg5[%c0_137, %c0_138] : memref<1x128xf32, #tpu.memory_space<vmem>>, vector<1x128xf32>
    %117 = vector.broadcast %116 : vector<1x128xf32> to vector<256x128xf32>
    %118 = arith.addf %115, %117 : vector<256x128xf32>
    %119 = vector.shape_cast %118 : vector<256x128xf32> to vector<1x16x16x128xf32>
    %120 = arith.truncf %119 : vector<1x16x16x128xf32> to vector<1x16x16x128xbf16>
    %c0_139 = arith.constant 0 : index
    %c0_140 = arith.constant 0 : index
    %c0_141 = arith.constant 0 : index
    %c0_142 = arith.constant 0 : index
    %121 = vector.load %arg6[%c0_139, %c0_140, %c0_141, %c0_142] : memref<1x16x16x128xbf16, #tpu.memory_space<vmem>>, vector<1x16x16x128xbf16>
    tpu.vector_store %arg6[%c0_139, %c0_140, %c0_141, %c0_142], %120 {strides = array<i32>} : memref<1x16x16x128xbf16, #tpu.memory_space<vmem>>, vector<1x16x16x128xbf16>,
    return
  }
  func.func @transform_0(%arg0: i32) -> (i32, i32, i32, i32) {
    %c0_i32 = arith.constant 0 : i32
    %c0_i32_0 = arith.constant 0 : i32
    %c0_i32_1 = arith.constant 0 : i32
    %c0_i32_2 = arith.constant 0 : i32
    return %arg0, %c0_i32, %c0_i32_0, %c0_i32_1 : i32, i32, i32, i32
  }
  func.func @transform_1(%arg0: i32) -> (i32, i32, i32, i32) {
    %c0_i32 = arith.constant 0 : i32
    %c0_i32_0 = arith.constant 0 : i32
    %c0_i32_1 = arith.constant 0 : i32
    %c0_i32_2 = arith.constant 0 : i32
    %c0_i32_3 = arith.constant 0 : i32
    return %c0_i32, %c0_i32_0, %c0_i32_1, %c0_i32_2 : i32, i32, i32, i32
  }
  func.func @transform_2(%arg0: i32) -> (i32, i32) {
    %c0_i32 = arith.constant 0 : i32
    %c0_i32_0 = arith.constant 0 : i32
    %c0_i32_1 = arith.constant 0 : i32
    return %c0_i32, %c0_i32_0 : i32, i32
  }
  func.func @transform_3(%arg0: i32) -> (i32, i32) {
    %c0_i32 = arith.constant 0 : i32
    %c0_i32_0 = arith.constant 0 : i32
    %c0_i32_1 = arith.constant 0 : i32
    return %c0_i32, %c0_i32_0 : i32, i32
  }
  func.func @transform_4(%arg0: i32) -> (i32, i32) {
    %c0_i32 = arith.constant 0 : i32
    %c0_i32_0 = arith.constant 0 : i32
    %c0_i32_1 = arith.constant 0 : i32
    return %c0_i32, %c0_i32_0 : i32, i32
  }
  func.func @transform_5(%arg0: i32) -> (i32, i32, i32, i32) {
    %c0_i32 = arith.constant 0 : i32
    %c0_i32_0 = arith.constant 0 : i32
    %c0_i32_1 = arith.constant 0 : i32
    %c0_i32_2 = arith.constant 0 : i32
    return %arg0, %c0_i32, %c0_i32_0, %c0_i32_1 : i32, i32, i32, i32
  }
}

</mosaic_0001>

<bundles_post_ra>
// kernel: tpu_custom_call.1
= control target key start
LH: loop header
LB: loop body
LE: loop exit
PB: predicated region body
PF: predicated region fallthrough
CT: control target
= control target key end

     0   :  { %10 = vsyncpa [#allocation4], 0  ;;  %s6056_s0 = inlined_call_operand.vmem [shape: bf16[2,16,16,4], index: 0, kind: input, shape index: {}]   ;;  %s6057_s1 = inlined_call_operand.vmem [shape: bf16[3,3,4,8], index: 1, kind: input, shape index: {}]   ;;  %s6058_s2 = inlined_call_operand.vmem [shape: f32[1,8], index: 2, kind: input, shape index: {}]   ;;  %s6059_s3 = inlined_call_operand.vmem [shape: bf16[8,128], index: 3, kind: input, shape index: {}]   ;;  %s6060_s4 = inlined_call_operand.vmem [shape: f32[1,128], index: 4, kind: input, shape index: {}]   ;;  %s6061_s5 = inlined_call_operand.hbm [shape: bf16[2,16,16,128], index: 5, kind: output, shape index: {}]  }
   0x1   :  { %12 = vsyncpa [#allocation4 + $0x1], 0  ;;  %s4927_s18 = smov 0   ;;  %s4929_s19 = smov 0  }
   0x2   :  { %s4931_s20 = smov 0   ;;  %s4933_s21 = smov 0  }
   0x3 LB: > { %s4948_s22 = sadd.s32 4294967295, %s4891_s21   ;;  %s3636_s23 = sadd.s32 4294967294, %s4891_s21   ;;  %s4891_s21 = sphi %s4933_s21, %s6079_s21   ;;  %s4887_s20 = sphi %s4931_s20, %s6078_s20   ;;  %s4883_s19 = sphi %s4929_s19, %s6077_s19   ;;  %s4879_s18 = sphi %s4927_s18, %s6076_s18  }
   0x4   : > { %s4952_s24 = sadd.s32 1, %s4891_s21   ;;  %s135_s25 = sadd.s32 1, %s4887_s20 }
   0x5   : > { %s132_s26 = ssub.s32 %s4891_s21, %s4952_s24  ;;  %p145_p0 = scmp.ne.s32.totalorder %s4887_s20, %s4883_s19 }
   0x6   : > { %p133_p1 = scmp.eq.s32.totalorder %s132_s26, 0  ;;  %p146_p2 = scmp.eq.s32.totalorder %s4948_s22, 1 }
   0x7   : > { %p151_p3 = scmp.ne.s32.totalorder %s4883_s19, %s4879_s18  ;;  %p152_p4 = scmp.eq.s32.totalorder %s3636_s23, 1 }
   0x8   : > { %s4963_s27 = scalar_select %p133_p1, %s4887_s20, %s135_s25  }
   0x9   : > { %p4965_p5 = por %p146_p2, %p145_p0  ;;  %p4969_p6 = por %p152_p4, %p151_p3 }
   0xa   : > { %p3639_p7 = scmp.ge.s32.totalorder %s4891_s21, 1  ;;  %p190_p8 = scmp.lt.s32.totalorder %s4891_s21, 3 }
   0xc   : > { %p191_p9 = pnand %p3639_p7, %p190_p8 }
   0xd   : > { %v3659_v0 = vld [vmem:[%s6057_s1 + $0x2] sm:$0x3] (!%p191_p9)  ;;  %vm845_vm0 = vcmask (!%p191_p9), 1041408   ;;  %v3726_v1 = vld [vmem:[%s6057_s1 + $0x8] sm:$0x3] (!%p191_p9)  ;;  %vm224_vm1 = vcmask (!%p191_p9), 31744  }
   0xe   : > { %194 = sbr.rel (%p191_p9) target bundleno = 807 (0x327), region = 40  ;;  %4761 = vmatprep.subr.msk.bf16.mxu1 (!%p191_p9), %vm845_vm0, %v3659_v0  ;;  %4765 = vmatprep.subr.msk.bf16.mxu0 (!%p191_p9), %vm845_vm0, %v3726_v1  ;;  %v847_v2 = vsel (!%p191_p9), %vm845_vm0, %v3659_v0, 0  ;;  %v1813_v3 = vsel (!%p191_p9), %vm845_vm0, %v3726_v1, 0  ;;  %p218_p10 = scmp.lt.s32.totalorder (!%p191_p9), %s4948_s22, 1  ;;  %v3743_v4 = vld [vmem:[%s6057_s1 + $0xa] sm:$0x3] (!%p191_p9) }
   0xf   : > { %4166 = vmatpush3.bf16.msra.mxu1 (!%p191_p9), %v847_v2  ;;  %4302 = vmatpush3.bf16.msra.mxu0 (!%p191_p9), %v1813_v3  ;;  %v4893_v5 = vmov (!%p191_p9), 0   ;;  %v778_v6 = vld [vmem:[%s6057_s1] sm:$0x3] (!%p191_p9)  ;;  %vm237_vm2 = vcmask (!%p191_p9), 24576   ;;  %vm238_vm3 = vsmask.f32 (!%p191_p9), 256 }
  0x10   : > { %229 = vst.msk [vmem:[#allocation2 + $0x90] sm:$0xff] (!%p191_p9), %vm224_vm1, %v4893_v5  ;;  %225 = vst.msk [vmem:[#allocation2] sm:$0xff] (!%p191_p9), %vm224_vm1, %v4893_v5  ;;  %4766 = vmatprep.subr.msk.bf16.mxu0 (!%p191_p9), %vm845_vm0, %v3743_v4  ;;  %4762 = vmatprep.subr.msk.bf16.mxu1 (!%p191_p9), %vm845_vm0, %v778_v6  ;;  %v240_v8 = vld [vmem:[#allocation2 + $0x8] sm:$0x1] (!%p191_p9)  ;;  %vm289_vm5 = vcmask (!%p191_p9), 31751   ;;  %v2075_v24 = vsel (!%p191_p9), %vm845_vm0, %v3743_v4, 0 }
  0x11   : > { %227 = vst.msk [vmem:[#allocation2 + $0x88] sm:$0xff] (!%p191_p9), %vm224_vm1, %v4893_v5  ;;  %231 = vst.msk [vmem:[#allocation2 + $0x118] sm:$0xff] (!%p191_p9), %vm224_vm1, %v4893_v5  ;;  %vm290_vm6 = vsmask.f32 (!%p191_p9), 7966  ;;  %v292_v10 = vld [vmem:[#allocation2 + $0x128] sm:$0x80] (!%p191_p9) }
  0x12   : > { %233 = vst.msk [vmem:[#allocation2 + $0x120] sm:$0xff] (!%p191_p9), %vm224_vm1, %v4893_v5  ;;  %235 = vst.msk [vmem:[#allocation2 + $0x1a8] sm:$0xff] (!%p191_p9), %vm224_vm1, %v4893_v5  ;;  %v295_v13 = vld [vmem:[#allocation2 + $0x130] sm:$0x80] (!%p191_p9)  ;;  %v243_v14 = vld [vmem:[#allocation2 + $0x10] sm:$0x1] (!%p191_p9) }
  0x13   : > { %vm5003_vm4 = vmand (!%p191_p9), %vm237_vm2, %vm238_vm3  ;;  %v1059_v28 = vsel (!%p191_p9), %vm845_vm0, %v778_v6, 0  ;;  %vm614_vm8 = vsmask.f32 (!%p191_p9), 7938  ;;  %vm712_vm9 = vsmask.f32 (!%p191_p9), 7424  ;;  %vm3235_vm12 = vcmask (!%p191_p9), 1043456  }
  0x14   : > { %v241_v9 = vsel (!%p191_p9), %vm5003_vm4, 0, %v240_v8  ;;  %vm5009_vm7 = vmand (!%p191_p9), %vm289_vm5, %vm290_vm6  ;;  %v244_v18 = vsel (!%p191_p9), %vm5003_vm4, 0, %v243_v14  ;;  %v5072_v33 = vld [vmem:[%s6057_s1 + $0xc] sm:$0x3] (!%p191_p9)  ;;  %vm3186_vm13 = vcmask (!%p191_p9), 64512   ;;  %s215_s16 = sand.u32 (!%p191_p9), 1, %s4883_s19  }
  0x15   : > { %s219_s13 = scalar_select %p218_p10, %s4948_s22, 1  ;;  %242 = vst [vmem:[#allocation2 + $0x8] sm:$0x1] %v241_v9  ;;  %v293_v12 = vsel %vm5009_vm7, 0, %v292_v10  ;;  %v296_v16 = vsel %vm5009_vm7, 0, %v295_v13  ;;  %vm5132_vm10 = vmand %vm224_vm1, %vm614_vm8 }
  0x16   : > { %294 = vst [vmem:[#allocation2 + $0x128] sm:$0x80] %v293_v12  ;;  %297 = vst [vmem:[#allocation2 + $0x130] sm:$0x80] %v296_v16  ;;  %s3640_s25 = sshll.u32 %s215_s16, 7  ;;  %s3899_s30 = sshll.u32 %s4948_s22, 11 }
  0x17   : > { %s3866_s14 = sshll.u32 %s219_s13, 7  ;;  %v779_v19 = vld [vmem:[#allocation2 + $0x90] sm:$0xff]  ;;  %245 = vst [vmem:[#allocation2 + $0x10] sm:$0x1] %v244_v18  ;;  %vm5158_vm11 = vmand %vm224_vm1, %vm712_vm9  ;;  %s5958_s26 = scalar_lea.vmem [#allocation3], %s3640_s25 }
  0x18   : > { %s5016_s17 = scalar_lea.vmem %s6056_s0, %s3866_s14  ;;  %4167 = vmatprep.mubr.msk.bf16.mxu1 %vm224_vm1, %v779_v19  ;;  %s3574_s6 = sshll.u32 %s5958_s26, 4  ;;  %s6009_s6 = int_to_ptr.vmem [resolvable:$true] %s3574_s6 }
  0x19   : > { %v5021_v15 = vld [vmem:[%s5016_s17] sm:$0xff]   ;;  %v5026_v17 = vld [vmem:[%s5016_s17 + $0x8] sm:$0xff]   ;;  %v5033_v20 = vld [vmem:[%s5016_s17 + $0x10] sm:$0xff]   ;;  %s6007_s9 = scalar_lea.hbm %s6061_s5, %s3899_s30  ;;  %s6015_s22 = scalar_lea.sflag [#allocation4], %s215_s16 }
  0x1a   : > { %469 = vst.msk [vmem:[#allocation2 + $0x98] sm:$0xff] %vm224_vm1, %v5021_v15  ;;  %470 = vst.msk [vmem:[#allocation2 + $0xa0] sm:$0xff] %vm224_vm1, %v5026_v17  ;;  %v5041_v21 = vld [vmem:[%s5016_s17 + $0x18] sm:$0xff]   ;;  %v5044_v22 = vld [vmem:[%s5016_s17 + $0x20] sm:$0xff]   ;;  %v486_v23 = vshrl.u32 %v5021_v15, 16  ;;  %v496_v25 = vshll.u32 %v5026_v17, 16 }
  0x1b   : > { %471 = vst.msk [vmem:[#allocation2 + $0xa8] sm:$0xff] %vm224_vm1, %v5033_v20  ;;  %472 = vst.msk [vmem:[#allocation2 + $0xb0] sm:$0xff] %vm224_vm1, %v5041_v21  ;;  %v5054_v26 = vld [vmem:[%s5016_s17 + $0x28] sm:$0xff]   ;;  %v5057_v27 = vld [vmem:[%s5016_s17 + $0x30] sm:$0xff]   ;;  %v489_v29 = vshll.u32 %v5021_v15, 16  ;;  %v493_v31 = vshrl.u32 %v5026_v17, 16 }
  0x1c   : > { %473 = vst.msk [vmem:[#allocation2 + $0xb8] sm:$0xff] %vm224_vm1, %v5044_v22  ;;  %474 = vst.msk [vmem:[#allocation2 + $0xc0] sm:$0xff] %vm224_vm1, %v5054_v26  ;;  %v5067_v32 = vld [vmem:[%s5016_s17 + $0x38] sm:$0xff]   ;;  %v488_v34 = vrot.slane %v486_v23, 7  ;;  %v500_v36 = vshrl.u32 %v5033_v20, 16  ;;  %v503_v37 = vshll.u32 %v5033_v20, 16 }
  0x1d   : > { %475 = vst.msk [vmem:[#allocation2 + $0xc8] sm:$0xff] %vm224_vm1, %v5057_v27  ;;  %476 = vst.msk [vmem:[#allocation2 + $0xd0] sm:$0xff] %vm224_vm1, %v5067_v32  ;;  %v5085_v39 = vld [vmem:[%s5016_s17 + $0x40] sm:$0xff]   ;;  %v666_v40 = vrot.slane %v496_v25, 1  ;;  %v5091_v41 = vld [vmem:[%s5016_s17 + $0x48] sm:$0xff]   ;;  %v507_v42 = vshrl.u32 %v5041_v21, 16 }
  0x1e   : > { %v510_v43 = vshll.u32 %v5041_v21, 16  ;;  %v514_v44 = vshrl.u32 %v5044_v22, 16  ;;  %477 = vst.msk [vmem:[#allocation2 + $0xd8] sm:$0xff] %vm224_vm1, %v5085_v39  ;;  %v5099_v45 = vld [vmem:[%s5016_s17 + $0x50] sm:$0xff]   ;;  %v517_v46 = vshll.u32 %v5044_v22, 16  ;;  %v521_v47 = vshrl.u32 %v5054_v26, 16 }
  0x1f   : > { %v524_v48 = vshll.u32 %v5054_v26, 16  ;;  %478 = vst.msk [vmem:[#allocation2 + $0xe0] sm:$0xff] %vm224_vm1, %v5091_v41  ;;  %v5109_v49 = vld [vmem:[%s5016_s17 + $0x58] sm:$0xff]   ;;  %v528_v50 = vshrl.u32 %v5057_v27, 16  ;;  %479 = vst.msk [vmem:[#allocation2 + $0xe8] sm:$0xff] %vm224_vm1, %v5099_v45  ;;  %v664_v51 = vrot.slane %v489_v29, 1  ;;  %v491_v58 = vor.u32 %v489_v29, %v488_v34 }
  0x20   : > { %v531_v54 = vshll.u32 %v5057_v27, 16  ;;  %480 = vst.msk [vmem:[#allocation2 + $0xf0] sm:$0xff] %vm224_vm1, %v5109_v49  ;;  %v495_v55 = vrot.slane %v493_v31, 7  ;;  %v535_v56 = vshrl.u32 %v5067_v32, 16  ;;  %v5121_v57 = vld [vmem:[%s5016_s17 + $0x60] sm:$0xff]   ;;  %v538_v59 = vshll.u32 %v5067_v32, 16 }
  0x21   : > { %v780_v30 = vld [vmem:[#allocation2 + $0x98] sm:$0xff]  ;;  %v1747_v35 = vld [vmem:[#allocation2 + $0xa0] sm:$0xff]  ;;  %v542_v60 = vshrl.u32 %v5085_v39, 16  ;;  %v545_v61 = vshll.u32 %v5085_v39, 16  ;;  %v5128_v62 = vld [vmem:[%s5016_s17 + $0x68] sm:$0xff]   ;;  %v667_v0 = vor.u32 %v666_v40, %v493_v31  ;;  %v549_v1 = vshrl.u32 %v5091_v41, 16 }
  0x22   : > { %4168 = vmatmul.mubr.msk.bf16.vlgmr.msra.gmra.mrb[0].mxu1 %vm224_vm1, %v780_v30  ;;  %4303 = vmatprep.mubr.msk.bf16.mxu0 %vm224_vm1, %v780_v30  ;;  %v782_v38 = vld [vmem:[#allocation2 + $0xa8] sm:$0xff]  ;;  %v1749_v52 = vld [vmem:[#allocation2 + $0xb0] sm:$0xff]  ;;  %v552_v2 = vshll.u32 %v5091_v41, 16  ;;  %481 = vst.msk [vmem:[#allocation2 + $0xf8] sm:$0xff] %vm224_vm1, %v5121_v57  ;;  %v5146_v4 = vld [vmem:[%s5016_s17 + $0x78] sm:$0xff]   ;;  %v665_v5 = vor.u32 %v664_v51, %v486_v23  ;;  %v556_v6 = vshrl.u32 %v5099_v45, 16  ;;  %v498_v10 = vor.u32 %v496_v25, %v495_v55 }
  0x23   : > { %4304 = vmatmul.mubr.msk.bf16.vlgmr.msra.gmra.mrb[0].mxu0 %vm224_vm1, %v1747_v35  ;;  %4171 = vmatprep.mubr.msk.bf16.mxu1 %vm224_vm1, %v1747_v35  ;;  %v5114_v53 = vld [vmem:[#allocation2 + $0xb8] sm:$0xff]  ;;  %v5143_v3 = vld [vmem:[%s5016_s17 + $0x70] sm:$0xff]   ;;  %v559_v8 = vshll.u32 %v5099_v45, 16  ;;  %482 = vst.msk [vmem:[#allocation2 + $0x100] sm:$0xff] %vm224_vm1, %v5128_v62  ;;  %v502_v12 = vrot.slane %v500_v36, 7  ;;  %v563_v13 = vshrl.u32 %v5109_v49, 16 }
  0x24   : > { %4336 = vmatpush3.bf16.msra.mxu0 %v2075_v24  ;;  %4307 = vmatprep.mubr.msk.bf16.mxu0 %vm224_vm1, %v782_v38  ;;  %v566_v14 = vshll.u32 %v5109_v49, 16  ;;  %483 = vst.msk [vmem:[#allocation2 + $0x108] sm:$0xff] %vm224_vm1, %v5143_v3  ;;  %484 = vst.msk [vmem:[#allocation2 + $0x110] sm:$0xff] %vm224_vm1, %v5146_v4  ;;  %v668_v15 = vrot.slane %v503_v37, 1  ;;  %v670_v16 = vrot.slane %v510_v43, 1  ;;  %v1751_v17 = vld [vmem:[#allocation2 + $0xc0] sm:$0xff] }
  0x25   : > { %4200 = vmatpush3.bf16.msra.mxu1 %v1059_v28  ;;  %4767 = vmatprep.subr.msk.bf16.mxu0 %vm845_vm0, %v5072_v33  ;;  %v570_v18 = vshrl.u32 %v5121_v57, 16  ;;  %v573_v19 = vshll.u32 %v5121_v57, 16  ;;  %v577_v23 = vshrl.u32 %v5128_v62, 16  ;;  %v580_v24 = vshll.u32 %v5128_v62, 16  ;;  %v616_v25 = vld [vmem:[#allocation2 + $0x8] sm:$0xff]  ;;  %v717_v35 = vld [vmem:[#allocation2 + $0x130] sm:$0xff] }
  0x26   : > { %v714_v28 = vld [vmem:[#allocation2 + $0x128] sm:$0xff]  ;;  %v5185_v31 = vsel %vm5132_vm10, %v491_v58, %v616_v25  ;;  %v509_v40 = vrot.slane %v507_v42, 7  ;;  %v5197_v51 = vsel %vm5158_vm11, %v667_v0, %v717_v35  ;;  %v246_v55 = vld [vmem:[#allocation2 + $0x18] sm:$0x1]  ;;  %v5205_v58 = vor.u32 %v503_v37, %v502_v12  ;;  %v301_v25 = vld [vmem:[#allocation2 + $0x140] sm:$0x80] }
  0x27   : > { %v5180_v29 = vld [vmem:[#allocation2 + $0xc8] sm:$0xff]  ;;  %v5189_v34 = vsel %vm5158_vm11, %v665_v5, %v714_v28  ;;  %618 = vst [vmem:[#allocation2 + $0x8] sm:$0xff] %v5185_v31  ;;  %v298_v5 = vld [vmem:[#allocation2 + $0x138] sm:$0x80]  ;;  %719 = vst [vmem:[#allocation2 + $0x130] sm:$0xff] %v5197_v51  ;;  %v247_v28 = vsel %vm5003_vm4, 0, %v246_v55  ;;  %v5221_v12 = vor.u32 %v668_v15, %v500_v36 }
  0x28   : > { %716 = vst [vmem:[#allocation2 + $0x128] sm:$0xff] %v5189_v34  ;;  %v299_v0 = vsel %vm5009_vm7, 0, %v298_v5  ;;  %v249_v35 = vld [vmem:[#allocation2 + $0x20] sm:$0x1]  ;;  %v516_v37 = vrot.slane %v514_v44, 7  ;;  %v672_v30 = vrot.slane %v517_v46, 1 }
  0x29   : > { %248 = vst [vmem:[#allocation2 + $0x18] sm:$0x1] %v247_v28  ;;  %300 = vst [vmem:[#allocation2 + $0x138] sm:$0x80] %v299_v0  ;;  %v250_v55 = vsel %vm5003_vm4, 0, %v249_v35  ;;  %v523_v15 = vrot.slane %v521_v47, 7  ;;  %v512_v35 = vor.u32 %v510_v43, %v509_v40 }
  0x2a   : > { %4172 = vmatmul.mubr.msk.bf16.gmra.mrb[4].mxu1 %vm224_vm1, %v782_v38  ;;  %v619_v38 = vld [vmem:[#allocation2 + $0x10] sm:$0xff]  ;;  %v252_v5 = vld [vmem:[#allocation2 + $0x28] sm:$0x1]  ;;  %251 = vst [vmem:[#allocation2 + $0x20] sm:$0x1] %v250_v55  ;;  %v519_v55 = vor.u32 %v517_v46, %v516_v37  ;;  %v678_v40 = vrot.slane %v538_v59, 1 }
  0x2b   : > { %4308 = vmatmul.mubr.msk.bf16.gmra.mrb[4].mxu0 %vm224_vm1, %v1749_v52  ;;  %4175 = vmatprep.mubr.msk.bf16.mxu1 %vm224_vm1, %v1749_v52  ;;  %v5201_v52 = vsel %vm5132_vm10, %v498_v10, %v619_v38  ;;  %v302_v10 = vsel %vm5009_vm7, 0, %v301_v25  ;;  %v5225_v38 = vor.u32 %v670_v16, %v507_v42  ;;  %v304_v25 = vld [vmem:[#allocation2 + $0x148] sm:$0x80]  ;;  %v253_v20 = vsel %vm5003_vm4, 0, %v252_v5  ;;  %v307_v42 = vld [vmem:[#allocation2 + $0x150] sm:$0x80] }
  0x2c   : > { %4311 = vmatprep.mubr.msk.bf16.mxu0 %vm224_vm1, %v5114_v53  ;;  %621 = vst [vmem:[#allocation2 + $0x10] sm:$0xff] %v5201_v52  ;;  %303 = vst [vmem:[#allocation2 + $0x140] sm:$0x80] %v302_v10  ;;  %v305_v36 = vsel %vm5009_vm7, 0, %v304_v25  ;;  %v587_v16 = vshll.u32 %v5143_v3, 16  ;;  %v308_v28 = vsel %vm5009_vm7, 0, %v307_v42 }
  0x2d   : > { %254 = vst [vmem:[#allocation2 + $0x28] sm:$0x1] %v253_v20  ;;  %306 = vst [vmem:[#allocation2 + $0x148] sm:$0x80] %v305_v36  ;;  %v255_v0 = vld [vmem:[#allocation2 + $0x30] sm:$0x1] }
  0x2e   : > { %v530_v10 = vrot.slane %v528_v50, 7  ;;  %309 = vst [vmem:[#allocation2 + $0x150] sm:$0x80] %v308_v28  ;;  %v256_v5 = vsel %vm5003_vm4, 0, %v255_v0  ;;  %v258_v25 = vld [vmem:[#allocation2 + $0x38] sm:$0x1]  ;;  %v5269_v28 = vor.u32 %v524_v48, %v523_v15 }
  0x2f   : > { %v310_v20 = vld [vmem:[#allocation2 + $0x158] sm:$0x80]  ;;  %v676_v36 = vrot.slane %v531_v54, 1  ;;  %v1753_v42 = vld [vmem:[#allocation2 + $0xd0] sm:$0xff]  ;;  %257 = vst [vmem:[#allocation2 + $0x30] sm:$0x1] %v256_v5 }
  0x30   : > { %v259_v21 = vsel %vm5003_vm4, 0, %v258_v25  ;;  %v311_v43 = vsel %vm5009_vm7, 0, %v310_v20  ;;  %v313_v46 = vld [vmem:[#allocation2 + $0x160] sm:$0x80]  ;;  %v264_v0 = vld [vmem:[#allocation2 + $0x48] sm:$0x1]  ;;  %v5279_v25 = vor.u32 %v531_v54, %v530_v10  ;;  %v5291_v54 = vor.u32 %v678_v40, %v535_v56 }
  0x31   : > { %260 = vst [vmem:[#allocation2 + $0x38] sm:$0x1] %v259_v21  ;;  %312 = vst [vmem:[#allocation2 + $0x158] sm:$0x80] %v311_v43  ;;  %v314_v22 = vsel %vm5009_vm7, 0, %v313_v46  ;;  %v5275_v5 = vld [vmem:[#allocation2 + $0xd8] sm:$0xff]  ;;  %v677_v43 = vor.u32 %v676_v36, %v528_v50 }
  0x32   : > { %4176 = vmatmul.mubr.msk.bf16.gmra.mrb[8].mxu1 %vm224_vm1, %v5114_v53  ;;  %v674_v53 = vrot.slane %v524_v48, 1  ;;  %315 = vst [vmem:[#allocation2 + $0x160] sm:$0x80] %v314_v22  ;;  %v544_v48 = vrot.slane %v542_v60, 7  ;;  %v622_v15 = vld [vmem:[#allocation2 + $0x18] sm:$0xff]  ;;  %s4829_s10 = scalar_lea.vmem %s6009_s6, 2048 }
  0x33   : > { %4312 = vmatmul.mubr.msk.bf16.gmra.mrb[8].mxu0 %vm224_vm1, %v1751_v17  ;;  %4179 = vmatprep.mubr.msk.bf16.mxu1 %vm224_vm1, %v1751_v17  ;;  %v673_v17 = vor.u32 %v672_v30, %v514_v44  ;;  %v261_v44 = vld [vmem:[#allocation2 + $0x40] sm:$0x1]  ;;  %v537_v30 = vrot.slane %v535_v56, 7  ;;  %v720_v20 = vld [vmem:[#allocation2 + $0x138] sm:$0xff]  ;;  %v5304_v27 = vsel %vm5132_vm10, %v5205_v58, %v622_v15  ;;  %v267_v36 = vld [vmem:[#allocation2 + $0x50] sm:$0x1]  ;;  %p4830_p11 = scmp.ne.s32.totalorder %s6009_s6, %s4829_s10 }
  0x34   : > { %4315 = vmatprep.mubr.msk.bf16.mxu0 %vm224_vm1, %v5180_v29  ;;  %v675_v37 = vor.u32 %v674_v53, %v521_v47  ;;  %v262_v26 = vsel %vm5003_vm4, 0, %v261_v44  ;;  %v265_v47 = vsel %vm5003_vm4, 0, %v264_v0  ;;  %v316_v53 = vld [vmem:[#allocation2 + $0x168] sm:$0x80]  ;;  %v723_v21 = vld [vmem:[#allocation2 + $0x140] sm:$0xff]  ;;  %v5309_v50 = vsel %vm5158_vm11, %v5221_v12, %v720_v20  ;;  %624 = vst [vmem:[#allocation2 + $0x18] sm:$0xff] %v5304_v27 }
  0x35   : > { %263 = vst [vmem:[#allocation2 + $0x40] sm:$0x1] %v262_v26  ;;  %v5295_v10 = vor.u32 %v538_v59, %v537_v30  ;;  %266 = vst [vmem:[#allocation2 + $0x48] sm:$0x1] %v265_v47  ;;  %v317_v46 = vsel %vm5009_vm7, 0, %v316_v53  ;;  %v5314_v32 = vsel %vm5158_vm11, %v5225_v38, %v723_v21  ;;  %v625_v56 = vld [vmem:[#allocation2 + $0x20] sm:$0xff]  ;;  %v547_v40 = vor.u32 %v545_v61, %v544_v48  ;;  %p4831_p12 = pnand %p4830_p11, %p4965_p5 }
  0x36   : > { %318 = vst [vmem:[#allocation2 + $0x168] sm:$0x80] %v317_v46  ;;  %v680_v59 = vrot.slane %v545_v61, 1  ;;  %722 = vst [vmem:[#allocation2 + $0x138] sm:$0xff] %v5309_v50  ;;  %v5325_v58 = vsel %vm5132_vm10, %v512_v35, %v625_v56  ;;  %v628_v12 = vld [vmem:[#allocation2 + $0x28] sm:$0xff]  ;;  %v729_v61 = vld [vmem:[#allocation2 + $0x150] sm:$0xff] }
  0x37   : > { %725 = vst [vmem:[#allocation2 + $0x140] sm:$0xff] %v5314_v32  ;;  %v726_v38 = vld [vmem:[#allocation2 + $0x148] sm:$0xff]  ;;  %v270_v44 = vld [vmem:[#allocation2 + $0x58] sm:$0x1]  ;;  %627 = vst [vmem:[#allocation2 + $0x20] sm:$0xff] %v5325_v58  ;;  %v5338_v35 = vsel %vm5132_vm10, %v519_v55, %v628_v12  ;;  %v268_v0 = vsel %vm5003_vm4, 0, %v267_v36  ;;  %v5352_v55 = vsel %vm5158_vm11, %v675_v37, %v729_v61  ;;  %p4832_p13 = pneg %p4831_p12 }
  0x38   : > { %v5342_v30 = vsel %vm5158_vm11, %v673_v17, %v726_v38  ;;  %v551_v26 = vrot.slane %v549_v1, 7  ;;  %v322_v47 = vld [vmem:[#allocation2 + $0x178] sm:$0x80]  ;;  %630 = vst [vmem:[#allocation2 + $0x28] sm:$0xff] %v5338_v35  ;;  %v631_v48 = vld [vmem:[#allocation2 + $0x30] sm:$0xff]  ;;  %v271_v17 = vsel %vm5003_vm4, 0, %v270_v44 }
  0x39   : > { %728 = vst [vmem:[#allocation2 + $0x148] sm:$0xff] %v5342_v30  ;;  %269 = vst [vmem:[#allocation2 + $0x50] sm:$0x1] %v268_v0  ;;  %v558_v53 = vrot.slane %v556_v6, 7  ;;  %v323_v15 = vsel %vm5009_vm7, 0, %v322_v47  ;;  %v5360_v21 = vld [vmem:[#allocation2 + $0xe0] sm:$0xff]  ;;  %v5366_v37 = vsel %vm5132_vm10, %v5269_v28, %v631_v48 }
  0x3a   : > { %4180 = vmatmul.mubr.msk.bf16.gmra.mrb[12].mxu1 %vm224_vm1, %v5180_v29  ;;  %v319_v29 = vld [vmem:[#allocation2 + $0x170] sm:$0x80]  ;;  %v325_v20 = vld [vmem:[#allocation2 + $0x180] sm:$0x80]  ;;  %731 = vst [vmem:[#allocation2 + $0x150] sm:$0xff] %v5352_v55  ;;  %v634_v46 = vld [vmem:[#allocation2 + $0x38] sm:$0xff] }
  0x3b   : > { %4316 = vmatmul.mubr.msk.bf16.gmra.mrb[12].mxu0 %vm224_vm1, %v1753_v42  ;;  %4183 = vmatprep.mubr.msk.bf16.mxu1 %vm224_vm1, %v1753_v42  ;;  %v320_v22 = vsel %vm5009_vm7, 0, %v319_v29  ;;  %v682_v42 = vrot.slane %v552_v2, 1  ;;  %v732_v56 = vld [vmem:[#allocation2 + $0x158] sm:$0xff]  ;;  %v681_v29 = vor.u32 %v680_v59, %v542_v60  ;;  %272 = vst [vmem:[#allocation2 + $0x58] sm:$0x1] %v271_v17  ;;  %v684_v36 = vrot.slane %v559_v8, 1 }
  0x3c   : > { %4319 = vmatprep.mubr.msk.bf16.mxu0 %vm224_vm1, %v5275_v5  ;;  %321 = vst [vmem:[#allocation2 + $0x170] sm:$0x80] %v320_v22  ;;  %324 = vst [vmem:[#allocation2 + $0x178] sm:$0x80] %v323_v15  ;;  %v326_v12 = vsel %vm5009_vm7, 0, %v325_v20  ;;  %v5374_v22 = vld [vmem:[#allocation2 + $0xe8] sm:$0xff]  ;;  %v5380_v28 = vsel %vm5132_vm10, %v5279_v25, %v634_v46  ;;  %v5384_v39 = vsel %vm5158_vm11, %v677_v43, %v732_v56 }
  0x3d   : > { %v273_v38 = vld [vmem:[#allocation2 + $0x60] sm:$0x1]  ;;  %633 = vst [vmem:[#allocation2 + $0x30] sm:$0xff] %v5366_v37  ;;  %v683_v59 = vor.u32 %v682_v42, %v549_v1  ;;  %327 = vst [vmem:[#allocation2 + $0x180] sm:$0x80] %v326_v12  ;;  %v686_v44 = vrot.slane %v566_v14, 1  ;;  %v554_v1 = vor.u32 %v552_v2, %v551_v26  ;;  %v561_v2 = vor.u32 %v559_v8, %v558_v53 }
  0x3e   : > { %v735_v60 = vld [vmem:[#allocation2 + $0x160] sm:$0xff]  ;;  %v276_v61 = vld [vmem:[#allocation2 + $0x68] sm:$0x1]  ;;  %v328_v0 = vld [vmem:[#allocation2 + $0x188] sm:$0x80]  ;;  %636 = vst [vmem:[#allocation2 + $0x38] sm:$0xff] %v5380_v28  ;;  %v685_v8 = vor.u32 %v684_v36, %v556_v6 }
  0x3f   : > { %734 = vst [vmem:[#allocation2 + $0x158] sm:$0xff] %v5384_v39  ;;  %v5395_v25 = vsel %vm5158_vm11, %v5291_v54, %v735_v60  ;;  %v637_v43 = vld [vmem:[#allocation2 + $0x40] sm:$0xff]  ;;  %v640_v47 = vld [vmem:[#allocation2 + $0x48] sm:$0xff]  ;;  %v274_v42 = vsel %vm5003_vm4, 0, %v273_v38  ;;  %v565_v48 = vrot.slane %v563_v13, 7  ;;  %v277_v26 = vsel %vm5003_vm4, 0, %v276_v61 }
  0x40   : > { %v331_v17 = vld [vmem:[#allocation2 + $0x190] sm:$0x80]  ;;  %737 = vst [vmem:[#allocation2 + $0x160] sm:$0xff] %v5395_v25  ;;  %v5407_v15 = vsel %vm5132_vm10, %v5295_v10, %v637_v43  ;;  %v5411_v54 = vsel %vm5132_vm10, %v547_v40, %v640_v47  ;;  %v738_v41 = vld [vmem:[#allocation2 + $0x168] sm:$0xff]  ;;  %275 = vst [vmem:[#allocation2 + $0x60] sm:$0x1] %v274_v42  ;;  %v687_v45 = vor.u32 %v686_v44, %v563_v13 }
  0x41   : > { %v279_v20 = vld [vmem:[#allocation2 + $0x70] sm:$0x1]  ;;  %v282_v46 = vld [vmem:[#allocation2 + $0x78] sm:$0x1]  ;;  %639 = vst [vmem:[#allocation2 + $0x40] sm:$0xff] %v5407_v15  ;;  %642 = vst [vmem:[#allocation2 + $0x48] sm:$0xff] %v5411_v54  ;;  %v5423_v10 = vsel %vm5158_vm11, %v681_v29, %v738_v41  ;;  %v568_v42 = vor.u32 %v566_v14, %v565_v48 }
  0x42   : > { %4184 = vmatmul.mubr.msk.bf16.gmra.mrb[16].mxu1 %vm224_vm1, %v5275_v5  ;;  %278 = vst [vmem:[#allocation2 + $0x68] sm:$0x1] %v277_v26  ;;  %v572_v40 = vrot.slane %v570_v18, 7  ;;  %v329_v53 = vsel %vm5009_vm7, 0, %v328_v0  ;;  %v334_v56 = vld [vmem:[#allocation2 + $0x198] sm:$0x80] }
  0x43   : > { %4320 = vmatmul.mubr.msk.bf16.gmra.mrb[16].mxu0 %vm224_vm1, %v5360_v21  ;;  %4187 = vmatprep.mubr.msk.bf16.mxu1 %vm224_vm1, %v5360_v21  ;;  %740 = vst [vmem:[#allocation2 + $0x168] sm:$0xff] %v5423_v10  ;;  %v741_v5 = vld [vmem:[#allocation2 + $0x170] sm:$0xff]  ;;  %330 = vst [vmem:[#allocation2 + $0x188] sm:$0x80] %v329_v53  ;;  %v688_v6 = vrot.slane %v573_v19, 1  ;;  %v332_v29 = vsel %vm5009_vm7, 0, %v331_v17 }
  0x44   : > { %v280_v36 = vsel %vm5003_vm4, 0, %v279_v20  ;;  %v337_v12 = vld [vmem:[#allocation2 + $0x1a0] sm:$0x80]  ;;  %4323 = vmatprep.mubr.msk.bf16.mxu0 %vm224_vm1, %v5374_v22  ;;  %v5448_v38 = vsel %vm5158_vm11, %v683_v59, %v741_v5  ;;  %v643_v60 = vld [vmem:[#allocation2 + $0x50] sm:$0xff]  ;;  %333 = vst [vmem:[#allocation2 + $0x190] sm:$0x80] %v332_v29  ;;  %v575_v49 = vor.u32 %v573_v19, %v572_v40 }
  0x45   : > { %v690_v13 = vrot.slane %v580_v24, 1  ;;  %281 = vst [vmem:[#allocation2 + $0x70] sm:$0x1] %v280_v36  ;;  %v579_v44 = vrot.slane %v577_v23, 7  ;;  %v283_v61 = vsel %vm5003_vm4, 0, %v282_v46  ;;  %743 = vst [vmem:[#allocation2 + $0x170] sm:$0xff] %v5448_v38  ;;  %v5464_v59 = vsel %vm5132_vm10, %v554_v1, %v643_v60 }
  0x46   : > { %v5459_v0 = vld [vmem:[%s6057_s1 + $0x4] sm:$0x3]  ;;  %v646_v43 = vld [vmem:[#allocation2 + $0x58] sm:$0xff]  ;;  %284 = vst [vmem:[#allocation2 + $0x78] sm:$0x1] %v283_v61  ;;  %v6072_v17 = vshrl.u32 %v5143_v3, 16 }
  0x47   : > { %v744_v47 = vld [vmem:[#allocation2 + $0x178] sm:$0xff]  ;;  %4763 = vmatprep.subr.msk.bf16.mxu1 %vm845_vm0, %v5459_v0  ;;  %645 = vst [vmem:[#allocation2 + $0x50] sm:$0xff] %v5464_v59  ;;  %v5475_v26 = vsel %vm5132_vm10, %v561_v2, %v646_v43  ;;  %v747_v20 = vld [vmem:[#allocation2 + $0x180] sm:$0xff]  ;;  %v335_v14 = vsel %vm5009_vm7, 0, %v334_v56  ;;  %v689_v2 = vor.u32 %v688_v6, %v570_v18  ;;  %v692_v46 = vrot.slane %v587_v16, 1  ;;  %s4894_s11 = smov [#allocation3]  }
  0x48   : > { %v586_v41 = vrot.slane %v6072_v17, 7  ;;  %v5479_v1 = vsel %vm5158_vm11, %v685_v8, %v744_v47  ;;  %648 = vst [vmem:[#allocation2 + $0x58] sm:$0xff] %v5475_v26  ;;  %v5489_v48 = vsel %vm5158_vm11, %v687_v45, %v747_v20  ;;  %336 = vst [vmem:[#allocation2 + $0x198] sm:$0x80] %v335_v14  ;;  %v338_v19 = vsel %vm5009_vm7, 0, %v337_v12  ;;  %v5497_v8 = vld [vmem:[#allocation2 + $0xf0] sm:$0xff] }
  0x49   : > { %746 = vst [vmem:[#allocation2 + $0x178] sm:$0xff] %v5479_v1  ;;  %v591_v40 = vshrl.u32 %v5146_v4, 16  ;;  %749 = vst [vmem:[#allocation2 + $0x180] sm:$0xff] %v5489_v48  ;;  %v649_v53 = vld [vmem:[#allocation2 + $0x60] sm:$0xff]  ;;  %v691_v56 = vor.u32 %v690_v13, %v577_v23  ;;  %v582_v57 = vor.u32 %v580_v24, %v579_v44  ;;  %v6073_v18 = vshll.u32 %v5146_v4, 16  ;;  %v5507_v45 = vld [vmem:[#allocation2 + $0xf8] sm:$0xff] }
  0x4a   : > { %339 = vst [vmem:[#allocation2 + $0x1a0] sm:$0x80] %v338_v19  ;;  %v5511_v11 = vsel %vm5132_vm10, %v568_v42, %v649_v53  ;;  %v652_v6 = vld [vmem:[#allocation2 + $0x68] sm:$0xff]  ;;  %v589_v29 = vor.u32 %v587_v16, %v586_v41  ;;  %4188 = vmatmul.mubr.msk.bf16.gmra.mrb[20].mxu1 %vm224_vm1, %v5374_v22  ;;  %v6074_v12 = vmov %v6072_v17  ;;  %v285_v41 = vld [vmem:[#allocation2 + $0x80] sm:$0x1]  ;;  %v5577_v19 = vld [vmem:[#allocation2 + $0x110] sm:$0xff] }
  0x4b   : > { %v694_v5 = vrot.slane %v6073_v18, 1  ;;  %651 = vst [vmem:[#allocation2 + $0x60] sm:$0xff] %v5511_v11  ;;  %v5520_v62 = vsel %vm5132_vm10, %v575_v49, %v652_v6  ;;  %v750_v23 = vld [vmem:[#allocation2 + $0x188] sm:$0xff]  ;;  %4324 = vmatmul.mubr.msk.bf16.gmra.mrb[20].mxu0 %vm224_vm1, %v5497_v8  ;;  %4191 = vmatprep.mubr.msk.bf16.mxu1 %vm224_vm1, %v5497_v8  ;;  %v753_v16 = vld [vmem:[#allocation2 + $0x190] sm:$0xff]  ;;  %v693_v60 = vor.u32 %v692_v46, %v6074_v12  ;;  %v5555_v20 = vld [vmem:[#allocation2 + $0x100] sm:$0xff]  ;;  %v286_v14 = vsel %vm5003_vm4, 0, %v285_v41 }
  0x4c   : > { %654 = vst [vmem:[#allocation2 + $0x68] sm:$0xff] %v5520_v62  ;;  %v5529_v24 = vsel %vm5158_vm11, %v689_v2, %v750_v23  ;;  %v655_v36 = vld [vmem:[#allocation2 + $0x70] sm:$0xff]  ;;  %4327 = vmatprep.mubr.msk.bf16.mxu0 %vm224_vm1, %v5507_v45  ;;  %v5538_v13 = vsel %vm5158_vm11, %v691_v56, %v753_v16  ;;  %v5564_v2 = vld [vmem:[#allocation2 + $0x108] sm:$0xff]  ;;  %287 = vst [vmem:[#allocation2 + $0x80] sm:$0x1] %v286_v14  ;;  %v593_v9 = vrot.slane %v591_v40, 7  ;;  %v6075_v7 = vmov %v6073_v18 }
  0x4d   : > { %752 = vst [vmem:[#allocation2 + $0x188] sm:$0xff] %v5529_v24  ;;  %v5542_v44 = vsel %vm5132_vm10, %v582_v57, %v655_v36  ;;  %v658_v61 = vld [vmem:[#allocation2 + $0x78] sm:$0xff]  ;;  %v695_v43 = vor.u32 %v694_v5, %v591_v40  ;;  %755 = vst [vmem:[#allocation2 + $0x190] sm:$0xff] %v5538_v13  ;;  %v762_v53 = vld [vmem:[#allocation2] sm:$0xff]  ;;  %v2338_v4 = vsel %vm845_vm0, %v5072_v33, 0  ;;  %v1289_v63 = vsel %vm845_vm0, %v5459_v0, 0 }
  0x4e   : > { %657 = vst [vmem:[#allocation2 + $0x70] sm:$0xff] %v5542_v44  ;;  %v5548_v3 = vsel %vm5132_vm10, %v589_v29, %v658_v61  ;;  %v596_v46 = vor.u32 %v6075_v7, %v593_v9  ;;  %v3777_v40 = vld [vmem:[%s6057_s1 + $0xe] sm:$0x3]  ;;  %v3709_v33 = vld [vmem:[%s6057_s1 + $0x6] sm:$0x3]  ;;  %v2536_v36 = vld [vmem:[#allocation2 + $0xb0] sm:$0xff] }
  0x4f   : > { %660 = vst [vmem:[#allocation2 + $0x78] sm:$0xff] %v5548_v3  ;;  %v756_v47 = vld [vmem:[#allocation2 + $0x198] sm:$0xff]  ;;  %v1222_v0 = vld [vmem:[#allocation2 + $0x120] sm:$0xff]  ;;  %v2601_v18 = vsel %vm845_vm0, %v3777_v40, 0  ;;  %v1551_v5 = vsel %vm845_vm0, %v3709_v33, 0  ;;  %v2535_v23 = vld [vmem:[#allocation2 + $0xa8] sm:$0xff] }
  0x50   : > { %v5553_v42 = vsel %vm5158_vm11, %v693_v60, %v756_v47  ;;  %v3794_v6 = vld [vmem:[%s6057_s1 + $0x10] sm:$0x3]  ;;  %v2534_v29 = vld [vmem:[#allocation2 + $0xa0] sm:$0xff]  ;;  %v2537_v12 = vld [vmem:[#allocation2 + $0xb8] sm:$0xff]  ;;  %s4833_s12 = sshll.u32 %s4894_s11, 4  ;;  %s4834_s12 = int_to_ptr.vmem [resolvable:$false] %s4833_s12 }
  0x51   : > { %v759_v17 = vld [vmem:[#allocation2 + $0x1a0] sm:$0xff]  ;;  %758 = vst [vmem:[#allocation2 + $0x198] sm:$0xff] %v5553_v42  ;;  %v2864_v16 = vsel %vm845_vm0, %v3794_v6, 0  ;;  %s4835_s13 = scalar_lea.vmem %s4834_s12, 4096  ;;  %p4836_p0 = scmp.lt.s32.totalorder %s6009_s6, %s4834_s12 }
  0x52   : > { %v5560_v49 = vsel %vm5158_vm11, %v695_v43, %v759_v17  ;;  %4192 = vmatmul.mubr.msk.bf16.gmra.mrb[24].mxu1 %vm224_vm1, %v5507_v45  ;;  %v2538_v60 = vld [vmem:[#allocation2 + $0xc0] sm:$0xff]  ;;  %p4837_p1 = scmp.lt.s32.totalorder %s4835_s13, %s4829_s10 }
  0x53   : > { %761 = vst [vmem:[#allocation2 + $0x1a0] sm:$0xff] %v5560_v49  ;;  %4328 = vmatmul.mubr.msk.bf16.gmra.mrb[24].mxu0 %vm224_vm1, %v5555_v20  ;;  %4195 = vmatprep.mubr.msk.bf16.mxu1 %vm224_vm1, %v5555_v20  ;;  %v661_v56 = vld [vmem:[#allocation2 + $0x80] sm:$0xff] }
  0x54   : > { %4331 = vmatprep.mubr.msk.bf16.mxu0 %vm224_vm1, %v5564_v2  ;;  %v5581_v57 = vsel %vm5132_vm10, %v596_v46, %v661_v56  ;;  %v5872_v14 = vld [vmem:[%s6058_s2] ss:$0 sm:$0xff]  ;;  %p4838_p2 = por %p4837_p1, %p4836_p0 }
  0x55   : > { %663 = vst [vmem:[#allocation2 + $0x80] sm:$0xff] %v5581_v57 }
  0x56   : > { %p4839_p3 = pnand %p4838_p2, %p4832_p13 }
  0x5a   : > { %4196 = vmatmul.mubr.msk.bf16.gmra.mrb[28].mxu1 %vm224_vm1, %v5564_v2 }
  0x5b   : > { %4332 = vmatmul.mubr.msk.bf16.gmra.mrb[28].mxu0 %vm224_vm1, %v5577_v19  ;;  %4201 = vmatprep.mubr.msk.bf16.mxu1 %vm224_vm1, %v762_v53 }
  0x5c   : > { %4337 = vmatprep.mubr.msk.bf16.mxu0 %vm224_vm1, %v5189_v34 }
  0x62   : > { %4202 = vmatmul.mubr.msk.bf16.vlgmr.msra.gmra.mrb[0].mxu1 %vm224_vm1, %v5185_v31 }
  0x63   : > { %4338 = vmatmul.mubr.msk.bf16.vlgmr.msra.gmra.mrb[0].mxu0 %vm224_vm1, %v5197_v51  ;;  %4205 = vmatprep.mubr.msk.bf16.mxu1 %vm224_vm1, %v5201_v52 }
  0x64   : > { %4370 = vmatpush3.bf16.msra.mxu0 %v2338_v4  ;;  %4341 = vmatprep.mubr.msk.bf16.mxu0 %vm224_vm1, %v5309_v50 }
  0x65   : > { %4234 = vmatpush3.bf16.msra.mxu1 %v1289_v63  ;;  %4768 = vmatprep.subr.msk.bf16.mxu0 %vm845_vm0, %v3777_v40 }
  0x66   : > { %4764 = vmatprep.subr.msk.bf16.mxu1 %vm845_vm0, %v3709_v33 }
  0x6a   : > { %4206 = vmatmul.mubr.msk.bf16.gmra.mrb[4].mxu1 %vm224_vm1, %v5304_v27 }
  0x6b   : > { %4342 = vmatmul.mubr.msk.bf16.gmra.mrb[4].mxu0 %vm224_vm1, %v5314_v32  ;;  %4209 = vmatprep.mubr.msk.bf16.mxu1 %vm224_vm1, %v5325_v58 }
  0x6c   : > { %4345 = vmatprep.mubr.msk.bf16.mxu0 %vm224_vm1, %v5342_v30 }
  0x72   : > { %4210 = vmatmul.mubr.msk.bf16.gmra.mrb[8].mxu1 %vm224_vm1, %v5338_v35 }
  0x73   : > { %4346 = vmatmul.mubr.msk.bf16.gmra.mrb[8].mxu0 %vm224_vm1, %v5352_v55  ;;  %4213 = vmatprep.mubr.msk.bf16.mxu1 %vm224_vm1, %v5366_v37 }
  0x74   : > { %4349 = vmatprep.mubr.msk.bf16.mxu0 %vm224_vm1, %v5384_v39 }
  0x7a   : > { %4214 = vmatmul.mubr.msk.bf16.gmra.mrb[12].mxu1 %vm224_vm1, %v5380_v28 }
  0x7b   : > { %4350 = vmatmul.mubr.msk.bf16.gmra.mrb[12].mxu0 %vm224_vm1, %v5395_v25  ;;  %4217 = vmatprep.mubr.msk.bf16.mxu1 %vm224_vm1, %v5407_v15 }
  0x7c   : > { %4353 = vmatprep.mubr.msk.bf16.mxu0 %vm224_vm1, %v5423_v10 }
  0x82   : > { %4218 = vmatmul.mubr.msk.bf16.gmra.mrb[16].mxu1 %vm224_vm1, %v5411_v54 }
  0x83   : > { %4354 = vmatmul.mubr.msk.bf16.gmra.mrb[16].mxu0 %vm224_vm1, %v5448_v38  ;;  %4221 = vmatprep.mubr.msk.bf16.mxu1 %vm224_vm1, %v5464_v59 }
  0x84   : > { %4357 = vmatprep.mubr.msk.bf16.mxu0 %vm224_vm1, %v5479_v1 }
  0x8a   : > { %4222 = vmatmul.mubr.msk.bf16.gmra.mrb[20].mxu1 %vm224_vm1, %v5475_v26 }
  0x8b   : > { %4358 = vmatmul.mubr.msk.bf16.gmra.mrb[20].mxu0 %vm224_vm1, %v5489_v48  ;;  %4225 = vmatprep.mubr.msk.bf16.mxu1 %vm224_vm1, %v5511_v11 }
  0x8c   : > { %4361 = vmatprep.mubr.msk.bf16.mxu0 %vm224_vm1, %v5529_v24 }
  0x92   : > { %4226 = vmatmul.mubr.msk.bf16.gmra.mrb[24].mxu1 %vm224_vm1, %v5520_v62 }
  0x93   : > { %4362 = vmatmul.mubr.msk.bf16.gmra.mrb[24].mxu0 %vm224_vm1, %v5538_v13  ;;  %4229 = vmatprep.mubr.msk.bf16.mxu1 %vm224_vm1, %v5542_v44 }
  0x94   : > { %4365 = vmatprep.mubr.msk.bf16.mxu0 %vm224_vm1, %v5553_v42 }
  0x9a   : > { %4230 = vmatmul.mubr.msk.bf16.gmra.mrb[28].mxu1 %vm224_vm1, %v5548_v3 }
  0x9b   : > { %4366 = vmatmul.mubr.msk.bf16.gmra.mrb[28].mxu0 %vm224_vm1, %v5560_v49  ;;  %4235 = vmatprep.mubr.msk.bf16.mxu1 %vm224_vm1, %v1222_v0 }
  0x9c   : > { %4371 = vmatprep.mubr.msk.bf16.mxu0 %vm224_vm1, %v5201_v52 }
  0xa2   : > { %4236 = vmatmul.mubr.msk.bf16.vlgmr.msra.gmra.mrb[0].mxu1 %vm224_vm1, %v5189_v34  ;;  %v2286_v34 = vld [vmem:[#allocation2 + $0x88] sm:$0xff] }
  0xa3   : > { %4372 = vmatmul.mubr.msk.bf16.vlgmr.msra.gmra.mrb[0].mxu0 %vm224_vm1, %v5304_v27  ;;  %4239 = vmatprep.mubr.msk.bf16.mxu1 %vm224_vm1, %v5197_v51 }
  0xa4   : > { %4404 = vmatpush3.bf16.msra.mxu0 %v2601_v18  ;;  %4375 = vmatprep.mubr.msk.bf16.mxu0 %vm224_vm1, %v5325_v58 }
  0xa5   : > { %4268 = vmatpush3.bf16.msra.mxu1 %v1551_v5  ;;  %4769 = vmatprep.subr.msk.bf16.mxu0 %vm845_vm0, %v3794_v6 }
  0xaa   : > { %4240 = vmatmul.mubr.msk.bf16.gmra.mrb[4].mxu1 %vm224_vm1, %v5309_v50 }
  0xab   : > { %4376 = vmatmul.mubr.msk.bf16.gmra.mrb[4].mxu0 %vm224_vm1, %v5338_v35  ;;  %4243 = vmatprep.mubr.msk.bf16.mxu1 %vm224_vm1, %v5314_v32 }
  0xac   : > { %4379 = vmatprep.mubr.msk.bf16.mxu0 %vm224_vm1, %v5366_v37 }
  0xb2   : > { %4244 = vmatmul.mubr.msk.bf16.gmra.mrb[8].mxu1 %vm224_vm1, %v5342_v30 }
  0xb3   : > { %4380 = vmatmul.mubr.msk.bf16.gmra.mrb[8].mxu0 %vm224_vm1, %v5380_v28  ;;  %4247 = vmatprep.mubr.msk.bf16.mxu1 %vm224_vm1, %v5352_v55 }
  0xb4   : > { %4383 = vmatprep.mubr.msk.bf16.mxu0 %vm224_vm1, %v5407_v15 }
  0xba   : > { %4248 = vmatmul.mubr.msk.bf16.gmra.mrb[12].mxu1 %vm224_vm1, %v5384_v39 }
  0xbb   : > { %4384 = vmatmul.mubr.msk.bf16.gmra.mrb[12].mxu0 %vm224_vm1, %v5411_v54  ;;  %4251 = vmatprep.mubr.msk.bf16.mxu1 %vm224_vm1, %v5395_v25 }
  0xbc   : > { %4387 = vmatprep.mubr.msk.bf16.mxu0 %vm224_vm1, %v5464_v59 }
  0xc2   : > { %4252 = vmatmul.mubr.msk.bf16.gmra.mrb[16].mxu1 %vm224_vm1, %v5423_v10 }
  0xc3   : > { %4388 = vmatmul.mubr.msk.bf16.gmra.mrb[16].mxu0 %vm224_vm1, %v5475_v26  ;;  %4255 = vmatprep.mubr.msk.bf16.mxu1 %vm224_vm1, %v5448_v38 }
  0xc4   : > { %4391 = vmatprep.mubr.msk.bf16.mxu0 %vm224_vm1, %v5511_v11 }
  0xca   : > { %4256 = vmatmul.mubr.msk.bf16.gmra.mrb[20].mxu1 %vm224_vm1, %v5479_v1 }
  0xcb   : > { %4392 = vmatmul.mubr.msk.bf16.gmra.mrb[20].mxu0 %vm224_vm1, %v5520_v62  ;;  %4259 = vmatprep.mubr.msk.bf16.mxu1 %vm224_vm1, %v5489_v48 }
  0xcc   : > { %4395 = vmatprep.mubr.msk.bf16.mxu0 %vm224_vm1, %v5542_v44 }
  0xd2   : > { %4260 = vmatmul.mubr.msk.bf16.gmra.mrb[24].mxu1 %vm224_vm1, %v5529_v24 }
  0xd3   : > { %4396 = vmatmul.mubr.msk.bf16.gmra.mrb[24].mxu0 %vm224_vm1, %v5548_v3  ;;  %4263 = vmatprep.mubr.msk.bf16.mxu1 %vm224_vm1, %v5538_v13 }
  0xd4   : > { %4399 = vmatprep.mubr.msk.bf16.mxu0 %vm224_vm1, %v5581_v57 }
  0xda   : > { %4264 = vmatmul.mubr.msk.bf16.gmra.mrb[28].mxu1 %vm224_vm1, %v5553_v42 }
  0xdb   : > { %4400 = vmatmul.mubr.msk.bf16.gmra.mrb[28].mxu0 %vm224_vm1, %v2286_v34  ;;  %4269 = vmatprep.mubr.msk.bf16.mxu1 %vm224_vm1, %v5185_v31  ;;  %v2539_v31 = vld [vmem:[#allocation2 + $0xc8] sm:$0xff] }
  0xdc   : > { %4405 = vmatprep.mubr.msk.bf16.mxu0 %vm224_vm1, %v2534_v29 }
  0xe2   : > { %4270 = vmatmul.mubr.msk.bf16.vlgmr.msra.gmra.mrb[0].mxu1 %vm224_vm1, %v5201_v52  ;;  %v2540_v52 = vld [vmem:[#allocation2 + $0xd0] sm:$0xff] }
  0xe3   : > { %4406 = vmatmul.mubr.msk.bf16.vlgmr.msra.gmra.mrb[0].mxu0 %vm224_vm1, %v2535_v23  ;;  %4273 = vmatprep.mubr.msk.bf16.mxu1 %vm224_vm1, %v5304_v27  ;;  %v2541_v27 = vld [vmem:[#allocation2 + $0xd8] sm:$0xff] }
  0xe4   : > { %4438 = vmatpush3.bf16.msra.mxu0 %v2864_v16  ;;  %4409 = vmatprep.mubr.msk.bf16.mxu0 %vm224_vm1, %v2536_v36 }
  0xea   : > { %4274 = vmatmul.mubr.msk.bf16.gmra.mrb[4].mxu1 %vm224_vm1, %v5325_v58  ;;  %v2549_v58 = vld [vmem:[#allocation2 + $0x118] sm:$0xff] }
  0xeb   : > { %4410 = vmatmul.mubr.msk.bf16.gmra.mrb[4].mxu0 %vm224_vm1, %v2537_v12  ;;  %4277 = vmatprep.mubr.msk.bf16.mxu1 %vm224_vm1, %v5338_v35 }
  0xec   : > { %4413 = vmatprep.mubr.msk.bf16.mxu0 %vm224_vm1, %v2538_v60 }
  0xf2   : > { %4278 = vmatmul.mubr.msk.bf16.gmra.mrb[8].mxu1 %vm224_vm1, %v5366_v37 }
  0xf3   : > { %4414 = vmatmul.mubr.msk.bf16.gmra.mrb[8].mxu0 %vm224_vm1, %v2539_v31  ;;  %4281 = vmatprep.mubr.msk.bf16.mxu1 %vm224_vm1, %v5380_v28 }
  0xf4   : > { %4417 = vmatprep.mubr.msk.bf16.mxu0 %vm224_vm1, %v2540_v52 }
  0xfa   : > { %4282 = vmatmul.mubr.msk.bf16.gmra.mrb[12].mxu1 %vm224_vm1, %v5407_v15 }
  0xfb   : > { %4418 = vmatmul.mubr.msk.bf16.gmra.mrb[12].mxu0 %vm224_vm1, %v2541_v27  ;;  %4285 = vmatprep.mubr.msk.bf16.mxu1 %vm224_vm1, %v5411_v54 }
  0xfc   : > { %4421 = vmatprep.mubr.msk.bf16.mxu0 %vm224_vm1, %v5360_v21 }
 0x102   : > { %4286 = vmatmul.mubr.msk.bf16.gmra.mrb[16].mxu1 %vm224_vm1, %v5464_v59 }
 0x103   : > { %4422 = vmatmul.mubr.msk.bf16.gmra.mrb[16].mxu0 %vm224_vm1, %v5374_v22  ;;  %4289 = vmatprep.mubr.msk.bf16.mxu1 %vm224_vm1, %v5475_v26 }
 0x104   : > { %4425 = vmatprep.mubr.msk.bf16.mxu0 %vm224_vm1, %v5497_v8 }
 0x10a   : > { %4290 = vmatmul.mubr.msk.bf16.gmra.mrb[20].mxu1 %vm224_vm1, %v5511_v11 }
 0x10b   : > { %4426 = vmatmul.mubr.msk.bf16.gmra.mrb[20].mxu0 %vm224_vm1, %v5507_v45  ;;  %4293 = vmatprep.mubr.msk.bf16.mxu1 %vm224_vm1, %v5520_v62 }
 0x10c   : > { %4429 = vmatprep.mubr.msk.bf16.mxu0 %vm224_vm1, %v5555_v20 }
 0x112   : > { %4294 = vmatmul.mubr.msk.bf16.gmra.mrb[24].mxu1 %vm224_vm1, %v5542_v44 }
 0x113   : > { %4430 = vmatmul.mubr.msk.bf16.gmra.mrb[24].mxu0 %vm224_vm1, %v5564_v2  ;;  %4297 = vmatprep.mubr.msk.bf16.mxu1 %vm224_vm1, %v5548_v3 }
 0x114   : > { %4433 = vmatprep.mubr.msk.bf16.mxu0 %vm224_vm1, %v5577_v19 }
 0x11a   : > { %4298 = vmatmul.mubr.msk.bf16.gmra.mrb[28].mxu1 %vm224_vm1, %v5581_v57 }
 0x11b   : > { %4434 = vmatmul.mubr.msk.bf16.gmra.mrb[28].mxu0 %vm224_vm1, %v2549_v58 }
 0x11c   : > { %4439 = vmatprep.mubr.msk.bf16.mxu0 %vm224_vm1, %v5197_v51  ;;  %v3178_v51 = vld [vmem:[%s6059_s3] sm:$0xf] }
 0x11d   : > { %4770 = vmatprep.subr.msk.bf16.mxu1 %vm3235_vm12, %v3178_v51 }
 0x123   : > { %4440 = vmatmul.mubr.msk.bf16.vlgmr.msra.gmra.mrb[0].mxu0 %vm224_vm1, %v5309_v50  ;;  %v3237_v50 = vsel %vm3235_vm12, %v3178_v51, 0 }
 0x124   : > { %4443 = vmatprep.mubr.msk.bf16.mxu0 %vm224_vm1, %v5314_v32  ;;  %4472 = vmatpush3.bf16.msra.mxu1 %v3237_v50  ;;  %v2812_v32 = vld [vmem:[#allocation2 + $0x1a8] sm:$0xff] }
 0x12b   : > { %4444 = vmatmul.mubr.msk.bf16.gmra.mrb[4].mxu0 %vm224_vm1, %v5342_v30 }
 0x12c   : > { %4447 = vmatprep.mubr.msk.bf16.mxu0 %vm224_vm1, %v5352_v55 }
 0x133   : > { %4448 = vmatmul.mubr.msk.bf16.gmra.mrb[8].mxu0 %vm224_vm1, %v5384_v39 }
 0x134   : > { %4451 = vmatprep.mubr.msk.bf16.mxu0 %vm224_vm1, %v5395_v25 }
 0x13b   : > { %4452 = vmatmul.mubr.msk.bf16.gmra.mrb[12].mxu0 %vm224_vm1, %v5423_v10 }
 0x13c   : > { %4455 = vmatprep.mubr.msk.bf16.mxu0 %vm224_vm1, %v5448_v38 }
 0x143   : > { %4456 = vmatmul.mubr.msk.bf16.gmra.mrb[16].mxu0 %vm224_vm1, %v5479_v1 }
 0x144   : > { %4459 = vmatprep.mubr.msk.bf16.mxu0 %vm224_vm1, %v5489_v48 }
 0x14b   : > { %4460 = vmatmul.mubr.msk.bf16.gmra.mrb[20].mxu0 %vm224_vm1, %v5529_v24 }
 0x14c   : > { %4463 = vmatprep.mubr.msk.bf16.mxu0 %vm224_vm1, %v5538_v13 }
 0x153   : > { %4464 = vmatmul.mubr.msk.bf16.gmra.mrb[24].mxu0 %vm224_vm1, %v5553_v42 }
 0x154   : > { %4467 = vmatprep.mubr.msk.bf16.mxu0 %vm224_vm1, %v5560_v49 }
 0x15b   : > { %4468 = vmatmul.mubr.msk.bf16.gmra.mrb[28].mxu0 %vm224_vm1, %v2812_v32 }
 0x1b5   : > { %v4271_v35 = vpop.f32.mrb[0].mxu1 }
 0x1b6   : > { %v1587_v30 = vpop.f32.mrb[1].mxu1 }
 0x1b7   : > { %v4272_v55 = vpop.f32.mrb[2].mxu1 }
 0x1b8   : > { %v1590_v21 = vpop.f32.mrb[3].mxu1 }
 0x1bd   : > { %v4275_v37 = vpop.f32.mrb[4].mxu1 }
 0x1be   : > { %v1603_v22 = vpop.f32.mrb[5].mxu1 }
 0x1bf   : > { %v4276_v28 = vpop.f32.mrb[6].mxu1 }
 0x1c0   : > { %v1606_v39 = vpop.f32.mrb[7].mxu1 }
 0x1c5   : > { %v5821_v25 = vpop.f32.mrb[8].mxu1 }
 0x1c6   : > { %v5823_v15 = vpop.f32.mrb[9].mxu1 }
 0x1c7   : > { %v5825_v54 = vpop.f32.mrb[10].mxu1 }
 0x1c8   : > { %v5827_v10 = vpop.f32.mrb[11].mxu1 }
 0x1cd   : > { %v5829_v38 = vpop.f32.mrb[12].mxu1 }
 0x1ce   : > { %v5831_v59 = vpop.f32.mrb[13].mxu1 }
 0x1cf   : > { %v5833_v26 = vpop.f32.mrb[14].mxu1 }
 0x1d0   : > { %v5835_v1 = vpop.f32.mrb[15].mxu1 }
 0x1d5   : > { %v5837_v48 = vpop.f32.mrb[16].mxu1 }
 0x1d6   : > { %v5839_v8 = vpop.f32.mrb[17].mxu1 }
 0x1d7   : > { %v5841_v45 = vpop.f32.mrb[18].mxu1 }
 0x1d8   : > { %v5843_v11 = vpop.f32.mrb[19].mxu1 }
 0x1dd   : > { %v5845_v62 = vpop.f32.mrb[20].mxu1 }
 0x1de   : > { %v5847_v24 = vpop.f32.mrb[21].mxu1 }
 0x1df   : > { %v5849_v13 = vpop.f32.mrb[22].mxu1 }
 0x1e0   : > { %v5851_v44 = vpop.f32.mrb[23].mxu1 }
 0x1e5   : > { %v5853_v61 = vpop.f32.mrb[24].mxu1 }
 0x1e6   : > { %v5855_v43 = vpop.f32.mrb[25].mxu1 }
 0x1e7   : > { %v5857_v3 = vpop.f32.mrb[26].mxu1 }
 0x1e8   : > { %v5859_v47 = vpop.f32.mrb[27].mxu1 }
 0x1ed   : > { %v5861_v42 = vpop.f32.mrb[28].mxu1 }
 0x1ee   : > { %v5863_v17 = vpop.f32.mrb[29].mxu1 }
 0x1ef   : > { %v5865_v41 = vpop.f32.mrb[30].mxu1 }
 0x1f0   : > { %v5867_v20 = vpop.f32.mrb[31].mxu1 }
 0x1f6   : > { %v4441_v49 = vpop.f32.mrb[0].mxu0 }
 0x1f7   : > { %v4505_v2 = vadd.f32 %v4441_v49, %v4271_v35  ;;  %v2900_v9 = vpop.f32.mrb[1].mxu0 }
 0x1f8   : > { %v4506_v7 = vadd.f32 %v2900_v9, %v1587_v30  ;;  %v4442_v46 = vpop.f32.mrb[2].mxu0 }
 0x1f9   : > { %v3068_v19 = vadd.f32 %v4505_v2, %v5872_v14  ;;  %v4507_v53 = vadd.f32 %v4442_v46, %v4272_v55  ;;  %v2903_v56 = vpop.f32.mrb[3].mxu0 }
 0x1fa   : > { %v3066_v57 = vadd.f32 %v4506_v7, %v5872_v14  ;;  %v4508_v4 = vadd.f32 %v2903_v56, %v1590_v21 }
 0x1fb   : > { %v3100_v63 = vmul.f32 0.1, %v3068_v19  ;;  %v3069_v40 = vadd.f32 %v4507_v53, %v5872_v14 }
 0x1fc   : > { %v3098_v33 = vmul.f32 0.1, %v3066_v57  ;;  %v3067_v0 = vadd.f32 %v4508_v4, %v5872_v14 }
 0x1fd   : > { %v3101_v18 = vmul.f32 0.1, %v3069_v40  ;;  %v3132_v34 = vmax.f32 %v3068_v19, %v3100_v63 }
 0x1fe   : > { %v3099_v5 = vmul.f32 0.1, %v3067_v0  ;;  %v4445_v6 = vpop.f32.mrb[4].mxu0  ;;  %v3130_v36 = vmax.f32 %v3066_v57, %v3098_v33 }
 0x1ff   : > { %v3133_v29 = vmax.f32 %v3069_v40, %v3101_v18  ;;  %v4509_v23 = vadd.f32 %v4445_v6, %v4275_v37  ;;  %v2916_v16 = vpop.f32.mrb[5].mxu0 }
 0x200   : > { %v3131_v12 = vmax.f32 %v3067_v0, %v3099_v5  ;;  %v4510_v60 = vadd.f32 %v2916_v16, %v1603_v22  ;;  %v4446_v31 = vpop.f32.mrb[6].mxu0 }
 0x201   : > { %v3163_v52 = vpack.c.bf16 %v3133_v29, %v3132_v34  ;;  %v3072_v27 = vadd.f32 %v4509_v23, %v5872_v14  ;;  %v4511_v58 = vadd.f32 %v4446_v31, %v4276_v28  ;;  %v2919_v51 = vpop.f32.mrb[7].mxu0 }
 0x202   : > { %v3162_v50 = vpack.c.bf16 %v3131_v12, %v3130_v36  ;;  %v3070_v32 = vadd.f32 %v4510_v60, %v5872_v14  ;;  %v4512_v35 = vadd.f32 %v2919_v51, %v1606_v39 }
 0x203   : > { %v3104_v30 = vmul.f32 0.1, %v3072_v27  ;;  %v3073_v55 = vadd.f32 %v4511_v58, %v5872_v14 }
 0x204   : > { %v3102_v21 = vmul.f32 0.1, %v3070_v32  ;;  %v3071_v37 = vadd.f32 %v4512_v35, %v5872_v14  ;;  %4473 = vmatprep.mubr.msk.bf16.mxu1 %vm3186_vm13, %v3162_v50 }
 0x205   : > { %v3105_v22 = vmul.f32 0.1, %v3073_v55  ;;  %4474 = vmatmul.mubr.msk.bf16.vlgmr.msra.gmra.mrb[32].mxu1 %vm3186_vm13, %v3163_v52  ;;  %v3136_v28 = vmax.f32 %v3072_v27, %v3104_v30 }
 0x206   : > { %v3103_v49 = vmul.f32 0.1, %v3071_v37  ;;  %v4449_v2 = vpop.f32.mrb[8].mxu0  ;;  %v3134_v19 = vmax.f32 %v3070_v32, %v3102_v21 }
 0x207   : > { %v3137_v9 = vmax.f32 %v3073_v55, %v3105_v22  ;;  %v4513_v7 = vadd.f32 %v4449_v2, %v5821_v25  ;;  %v2932_v46 = vpop.f32.mrb[9].mxu0 }
 0x208   : > { %v3135_v39 = vmax.f32 %v3071_v37, %v3103_v49  ;;  %v4514_v53 = vadd.f32 %v2932_v46, %v5823_v15  ;;  %v4450_v56 = vpop.f32.mrb[10].mxu0 }
 0x209   : > { %v3165_v57 = vpack.c.bf16 %v3137_v9, %v3136_v28  ;;  %v3076_v4 = vadd.f32 %v4513_v7, %v5872_v14  ;;  %v4515_v63 = vadd.f32 %v4450_v56, %v5825_v54  ;;  %v2935_v40 = vpop.f32.mrb[11].mxu0 }
 0x20a   : > { %v3164_v33 = vpack.c.bf16 %v3135_v39, %v3134_v19  ;;  %v3074_v0 = vadd.f32 %v4514_v53, %v5872_v14  ;;  %v4516_v18 = vadd.f32 %v2935_v40, %v5827_v10 }
 0x20b   : > { %v3108_v5 = vmul.f32 0.1, %v3076_v4  ;;  %v3077_v25 = vadd.f32 %v4515_v63, %v5872_v14 }
 0x20c   : > { %v3106_v6 = vmul.f32 0.1, %v3074_v0  ;;  %v3075_v34 = vadd.f32 %v4516_v18, %v5872_v14  ;;  %4477 = vmatprep.mubr.msk.bf16.mxu1 %vm3186_vm13, %v3164_v33 }
 0x20d   : > { %v3109_v15 = vmul.f32 0.1, %v3077_v25  ;;  %4478 = vmatmul.mubr.msk.bf16.gmra.mrb[36].mxu1 %vm3186_vm13, %v3165_v57  ;;  %v3140_v54 = vmax.f32 %v3076_v4, %v3108_v5 }
 0x20e   : > { %v3107_v29 = vmul.f32 0.1, %v3075_v34  ;;  %v4453_v23 = vpop.f32.mrb[12].mxu0  ;;  %v3138_v60 = vmax.f32 %v3074_v0, %v3106_v6 }
 0x20f   : > { %v3141_v16 = vmax.f32 %v3077_v25, %v3109_v15  ;;  %v4517_v36 = vadd.f32 %v4453_v23, %v5829_v38  ;;  %v2948_v12 = vpop.f32.mrb[13].mxu0 }
 0x210   : > { %v3139_v10 = vmax.f32 %v3075_v34, %v3107_v29  ;;  %v4518_v31 = vadd.f32 %v2948_v12, %v5831_v59  ;;  %v4454_v52 = vpop.f32.mrb[14].mxu0 }
 0x211   : > { %v3167_v27 = vpack.c.bf16 %v3141_v16, %v3140_v54  ;;  %v3080_v58 = vadd.f32 %v4517_v36, %v5872_v14  ;;  %v4519_v51 = vadd.f32 %v4454_v52, %v5833_v26  ;;  %v2951_v50 = vpop.f32.mrb[15].mxu0 }
 0x212   : > { %v3166_v32 = vpack.c.bf16 %v3139_v10, %v3138_v60  ;;  %v3078_v35 = vadd.f32 %v4518_v31, %v5872_v14  ;;  %v4520_v30 = vadd.f32 %v2951_v50, %v5835_v1 }
 0x213   : > { %v3112_v55 = vmul.f32 0.1, %v3080_v58  ;;  %v3081_v38 = vadd.f32 %v4519_v51, %v5872_v14 }
 0x214   : > { %v3110_v21 = vmul.f32 0.1, %v3078_v35  ;;  %v3079_v37 = vadd.f32 %v4520_v30, %v5872_v14  ;;  %4481 = vmatprep.mubr.msk.bf16.mxu1 %vm3186_vm13, %v3166_v32 }
 0x215   : > { %v3113_v59 = vmul.f32 0.1, %v3081_v38  ;;  %4482 = vmatmul.mubr.msk.bf16.gmra.mrb[40].mxu1 %vm3186_vm13, %v3167_v27  ;;  %v3144_v26 = vmax.f32 %v3080_v58, %v3112_v55 }
 0x216   : > { %v3111_v22 = vmul.f32 0.1, %v3079_v37  ;;  %v4457_v49 = vpop.f32.mrb[16].mxu0  ;;  %v3142_v7 = vmax.f32 %v3078_v35, %v3110_v21 }
 0x217   : > { %v3145_v2 = vmax.f32 %v3081_v38, %v3113_v59  ;;  %v4521_v28 = vadd.f32 %v4457_v49, %v5837_v48  ;;  %v2964_v9 = vpop.f32.mrb[17].mxu0 }
 0x218   : > { %v3143_v1 = vmax.f32 %v3079_v37, %v3111_v22  ;;  %v4522_v46 = vadd.f32 %v2964_v9, %v5839_v8  ;;  %v4458_v19 = vpop.f32.mrb[18].mxu0 }
 0x219   : > { %v3169_v39 = vpack.c.bf16 %v3145_v2, %v3144_v26  ;;  %v3084_v53 = vadd.f32 %v4521_v28, %v5872_v14  ;;  %v4523_v56 = vadd.f32 %v4458_v19, %v5841_v45  ;;  %v2967_v57 = vpop.f32.mrb[19].mxu0 }
 0x21a   : > { %v3168_v4 = vpack.c.bf16 %v3143_v1, %v3142_v7  ;;  %v3082_v63 = vadd.f32 %v4522_v46, %v5872_v14  ;;  %v4524_v40 = vadd.f32 %v2967_v57, %v5843_v11 }
 0x21b   : > { %v3116_v33 = vmul.f32 0.1, %v3084_v53  ;;  %v3085_v48 = vadd.f32 %v4523_v56, %v5872_v14 }
 0x21c   : > { %v3114_v0 = vmul.f32 0.1, %v3082_v63  ;;  %v3083_v18 = vadd.f32 %v4524_v40, %v5872_v14  ;;  %4485 = vmatprep.mubr.msk.bf16.mxu1 %vm3186_vm13, %v3168_v4 }
 0x21d   : > { %v3117_v8 = vmul.f32 0.1, %v3085_v48  ;;  %4486 = vmatmul.mubr.msk.bf16.gmra.mrb[44].mxu1 %vm3186_vm13, %v3169_v39  ;;  %v3148_v45 = vmax.f32 %v3084_v53, %v3116_v33 }
 0x21e   : > { %v3115_v5 = vmul.f32 0.1, %v3083_v18  ;;  %v4461_v25 = vpop.f32.mrb[20].mxu0  ;;  %v3146_v29 = vmax.f32 %v3082_v63, %v3114_v0 }
 0x21f   : > { %v3149_v6 = vmax.f32 %v3085_v48, %v3117_v8  ;;  %v4525_v34 = vadd.f32 %v4461_v25, %v5845_v62  ;;  %v2980_v15 = vpop.f32.mrb[21].mxu0 }
 0x220   : > { %v3147_v11 = vmax.f32 %v3083_v18, %v3115_v5  ;;  %v4526_v23 = vadd.f32 %v2980_v15, %v5847_v24  ;;  %v4462_v54 = vpop.f32.mrb[22].mxu0 }
 0x221   : > { %v3171_v16 = vpack.c.bf16 %v3149_v6, %v3148_v45  ;;  %v3088_v36 = vadd.f32 %v4525_v34, %v5872_v14  ;;  %v4527_v12 = vadd.f32 %v4462_v54, %v5849_v13  ;;  %v2983_v60 = vpop.f32.mrb[23].mxu0 }
 0x222   : > { %v3170_v10 = vpack.c.bf16 %v3147_v11, %v3146_v29  ;;  %v3086_v31 = vadd.f32 %v4526_v23, %v5872_v14  ;;  %v4528_v52 = vadd.f32 %v2983_v60, %v5851_v44 }
 0x223   : > { %v3120_v27 = vmul.f32 0.1, %v3088_v36  ;;  %v3089_v62 = vadd.f32 %v4527_v12, %v5872_v14 }
 0x224   : > { %v3118_v58 = vmul.f32 0.1, %v3086_v31  ;;  %v3087_v51 = vadd.f32 %v4528_v52, %v5872_v14  ;;  %4489 = vmatprep.mubr.msk.bf16.mxu1 %vm3186_vm13, %v3170_v10 }
 0x225   : > { %v3121_v24 = vmul.f32 0.1, %v3089_v62  ;;  %4490 = vmatmul.mubr.msk.bf16.gmra.mrb[48].mxu1 %vm3186_vm13, %v3171_v16  ;;  %v3152_v13 = vmax.f32 %v3088_v36, %v3120_v27 }
 0x226   : > { %v3119_v50 = vmul.f32 0.1, %v3087_v51  ;;  %v4465_v32 = vpop.f32.mrb[24].mxu0  ;;  %v3150_v38 = vmax.f32 %v3086_v31, %v3118_v58 }
 0x227   : > { %v3153_v35 = vmax.f32 %v3089_v62, %v3121_v24  ;;  %v4529_v30 = vadd.f32 %v4465_v32, %v5853_v61  ;;  %v2996_v55 = vpop.f32.mrb[25].mxu0 }
 0x228   : > { %v3151_v44 = vmax.f32 %v3087_v51, %v3119_v50  ;;  %v4530_v21 = vadd.f32 %v2996_v55, %v5855_v43  ;;  %v4466_v37 = vpop.f32.mrb[26].mxu0 }
 0x229   : > { %v3173_v59 = vpack.c.bf16 %v3153_v35, %v3152_v13  ;;  %v3092_v22 = vadd.f32 %v4529_v30, %v5872_v14  ;;  %v4531_v49 = vadd.f32 %v4466_v37, %v5857_v3  ;;  %v2999_v26 = vpop.f32.mrb[27].mxu0 }
 0x22a   : > { %v3172_v2 = vpack.c.bf16 %v3151_v44, %v3150_v38  ;;  %v3090_v28 = vadd.f32 %v4530_v21, %v5872_v14  ;;  %v4532_v9 = vadd.f32 %v2999_v26, %v5859_v47 }
 0x22b   : > { %v3124_v7 = vmul.f32 0.1, %v3092_v22  ;;  %v3093_v61 = vadd.f32 %v4531_v49, %v5872_v14 }
 0x22c   : > { %v3122_v1 = vmul.f32 0.1, %v3090_v28  ;;  %v3091_v46 = vadd.f32 %v4532_v9, %v5872_v14  ;;  %4493 = vmatprep.mubr.msk.bf16.mxu1 %vm3186_vm13, %v3172_v2 }
 0x22d   : > { %v3125_v43 = vmul.f32 0.1, %v3093_v61  ;;  %4494 = vmatmul.mubr.msk.bf16.gmra.mrb[52].mxu1 %vm3186_vm13, %v3173_v59  ;;  %v3156_v3 = vmax.f32 %v3092_v22, %v3124_v7 }
 0x22e   : > { %v3123_v19 = vmul.f32 0.1, %v3091_v46  ;;  %v4469_v39 = vpop.f32.mrb[28].mxu0  ;;  %v3154_v4 = vmax.f32 %v3090_v28, %v3122_v1 }
 0x22f   : > { %v3157_v53 = vmax.f32 %v3093_v61, %v3125_v43  ;;  %v4533_v56 = vadd.f32 %v4469_v39, %v5861_v42  ;;  %v3012_v57 = vpop.f32.mrb[29].mxu0 }
 0x230   : > { %v3155_v47 = vmax.f32 %v3091_v46, %v3123_v19  ;;  %v4534_v63 = vadd.f32 %v3012_v57, %v5863_v17  ;;  %v4470_v40 = vpop.f32.mrb[30].mxu0 }
 0x231   : > { %v3175_v33 = vpack.c.bf16 %v3157_v53, %v3156_v3  ;;  %v3096_v48 = vadd.f32 %v4533_v56, %v5872_v14  ;;  %v4535_v0 = vadd.f32 %v4470_v40, %v5865_v41  ;;  %v3015_v18 = vpop.f32.mrb[31].mxu0 }
 0x232   : > { %v3174_v8 = vpack.c.bf16 %v3155_v47, %v3154_v4  ;;  %v3094_v5 = vadd.f32 %v4534_v63, %v5872_v14  ;;  %v4536_v25 = vadd.f32 %v3015_v18, %v5867_v20 }
 0x233   : > { %v3128_v45 = vmul.f32 0.1, %v3096_v48  ;;  %v3097_v42 = vadd.f32 %v4535_v0, %v5872_v14 }
 0x234   : > { %v3126_v6 = vmul.f32 0.1, %v3094_v5  ;;  %v3095_v34 = vadd.f32 %v4536_v25, %v5872_v14  ;;  %4497 = vmatprep.mubr.msk.bf16.mxu1 %vm3186_vm13, %v3174_v8  ;;  %v5950_v14 = vld [vmem:[%s6060_s4] ss:$0 sm:$0xff] }
 0x235   : > { %v3129_v17 = vmul.f32 0.1, %v3097_v42  ;;  %4498 = vmatmul.mubr.msk.bf16.gmra.mrb[56].mxu1 %vm3186_vm13, %v3175_v33  ;;  %v3160_v15 = vmax.f32 %v3096_v48, %v3128_v45 }
 0x236   : > { %v3127_v41 = vmul.f32 0.1, %v3095_v34  ;;  %v3158_v11 = vmax.f32 %v3094_v5, %v3126_v6 }
 0x237   : > { %v3161_v29 = vmax.f32 %v3097_v42, %v3129_v17 }
 0x238   : > { %v3159_v23 = vmax.f32 %v3095_v34, %v3127_v41 }
 0x239   : > { %v3177_v54 = vpack.c.bf16 %v3161_v29, %v3160_v15 }
 0x23a   : > { %v3176_v20 = vpack.c.bf16 %v3159_v23, %v3158_v11 }
 0x23c   : > { %4501 = vmatprep.mubr.msk.bf16.mxu1 %vm3186_vm13, %v3176_v20 }
 0x23d   : > { %4502 = vmatmul.mubr.msk.bf16.gmra.mrb[60].mxu1 %vm3186_vm13, %v3177_v54 }
 0x2d8   : > { %v4475_v16 = vpop.f32.mrb[32].mxu1 }
 0x2d9   : > { %v3273_v36 = vpop.f32.mrb[33].mxu1  ;;  %v3282_v60 = vadd.f32 %v4475_v16, %v5950_v14 }
 0x2da   : > { %v4476_v12 = vpop.f32.mrb[34].mxu1  ;;  %v3274_v52 = vadd.f32 %v5950_v14, %v3273_v36 }
 0x2db   : > { %v3285_v10 = vadd.f32 %v4476_v12, %v5950_v14  ;;  %v3276_v31 = vpop.f32.mrb[35].mxu1 }
 0x2dc   : > { %v3277_v27 = vadd.f32 %v5950_v14, %v3276_v31 }
 0x2dd   : > { %v3908_v62 = vpack.c.bf16 %v3285_v10, %v3282_v60 }
 0x2de   : > { %v3903_v58 = vpack.c.bf16 %v3277_v27, %v3274_v52 }
 0x2df   : > { %3980 = vst [vmem:[%s5958_s26 + $0x8] sm:$0xff] %v3908_v62  }
 0x2e0   : > { %3904 = vst [vmem:[%s5958_s26] sm:$0xff] %v3903_v58   ;;  %v4479_v51 = vpop.f32.mrb[36].mxu1 }
 0x2e1   : > { %v3289_v24 = vpop.f32.mrb[37].mxu1  ;;  %v3298_v32 = vadd.f32 %v4479_v51, %v5950_v14 }
 0x2e2   : > { %v4480_v50 = vpop.f32.mrb[38].mxu1  ;;  %v3290_v30 = vadd.f32 %v5950_v14, %v3289_v24 }
 0x2e3   : > { %v3301_v13 = vadd.f32 %v4480_v50, %v5950_v14  ;;  %v3292_v35 = vpop.f32.mrb[39].mxu1 }
 0x2e4   : > { %v3293_v55 = vadd.f32 %v5950_v14, %v3292_v35 }
 0x2e5   : > { %v3918_v38 = vpack.c.bf16 %v3301_v13, %v3298_v32 }
 0x2e6   : > { %v3913_v44 = vpack.c.bf16 %v3293_v55, %v3290_v30 }
 0x2e7   : > { %3982 = vst [vmem:[%s5958_s26 + $0x18] sm:$0xff] %v3918_v38  }
 0x2e8   : > { %3981 = vst [vmem:[%s5958_s26 + $0x10] sm:$0xff] %v3913_v44   ;;  %v4483_v21 = vpop.f32.mrb[40].mxu1 }
 0x2e9   : > { %v3305_v37 = vpop.f32.mrb[41].mxu1  ;;  %v3314_v22 = vadd.f32 %v4483_v21, %v5950_v14 }
 0x2ea   : > { %v4484_v59 = vpop.f32.mrb[42].mxu1  ;;  %v3306_v2 = vadd.f32 %v5950_v14, %v3305_v37 }
 0x2eb   : > { %v3317_v49 = vadd.f32 %v4484_v59, %v5950_v14  ;;  %v3308_v26 = vpop.f32.mrb[43].mxu1 }
 0x2ec   : > { %v3309_v28 = vadd.f32 %v5950_v14, %v3308_v26 }
 0x2ed   : > { %v3928_v9 = vpack.c.bf16 %v3317_v49, %v3314_v22 }
 0x2ee   : > { %v3923_v7 = vpack.c.bf16 %v3309_v28, %v3306_v2 }
 0x2ef   : > { %3984 = vst [vmem:[%s5958_s26 + $0x28] sm:$0xff] %v3928_v9  }
 0x2f0   : > { %3983 = vst [vmem:[%s5958_s26 + $0x20] sm:$0xff] %v3923_v7   ;;  %v4487_v61 = vpop.f32.mrb[44].mxu1 }
 0x2f1   : > { %v3321_v1 = vpop.f32.mrb[45].mxu1  ;;  %v3330_v43 = vadd.f32 %v4487_v61, %v5950_v14 }
 0x2f2   : > { %v4488_v46 = vpop.f32.mrb[46].mxu1  ;;  %v3322_v3 = vadd.f32 %v5950_v14, %v3321_v1 }
 0x2f3   : > { %v3333_v19 = vadd.f32 %v4488_v46, %v5950_v14  ;;  %v3324_v39 = vpop.f32.mrb[47].mxu1 }
 0x2f4   : > { %v3325_v53 = vadd.f32 %v5950_v14, %v3324_v39 }
 0x2f5   : > { %v3938_v56 = vpack.c.bf16 %v3333_v19, %v3330_v43 }
 0x2f6   : > { %v3933_v57 = vpack.c.bf16 %v3325_v53, %v3322_v3 }
 0x2f7   : > { %3986 = vst [vmem:[%s5958_s26 + $0x38] sm:$0xff] %v3938_v56  }
 0x2f8   : > { %3985 = vst [vmem:[%s5958_s26 + $0x30] sm:$0xff] %v3933_v57   ;;  %v4491_v4 = vpop.f32.mrb[48].mxu1 }
 0x2f9   : > { %v3337_v47 = vpop.f32.mrb[49].mxu1  ;;  %v3346_v40 = vadd.f32 %v4491_v4, %v5950_v14 }
 0x2fa   : > { %v4492_v63 = vpop.f32.mrb[50].mxu1  ;;  %v3338_v0 = vadd.f32 %v5950_v14, %v3337_v47 }
 0x2fb   : > { %v3349_v33 = vadd.f32 %v4492_v63, %v5950_v14  ;;  %v3340_v48 = vpop.f32.mrb[51].mxu1 }
 0x2fc   : > { %v3341_v18 = vadd.f32 %v5950_v14, %v3340_v48 }
 0x2fd   : > { %v3948_v8 = vpack.c.bf16 %v3349_v33, %v3346_v40 }
 0x2fe   : > { %v3943_v5 = vpack.c.bf16 %v3341_v18, %v3338_v0 }
 0x2ff   : > { %3988 = vst [vmem:[%s5958_s26 + $0x48] sm:$0xff] %v3948_v8  }
 0x300   : > { %3987 = vst [vmem:[%s5958_s26 + $0x40] sm:$0xff] %v3943_v5   ;;  %v4495_v25 = vpop.f32.mrb[52].mxu1 }
 0x301   : > { %v3353_v45 = vpop.f32.mrb[53].mxu1  ;;  %v3362_v6 = vadd.f32 %v4495_v25, %v5950_v14 }
 0x302   : > { %v4496_v42 = vpop.f32.mrb[54].mxu1  ;;  %v3354_v41 = vadd.f32 %v5950_v14, %v3353_v45 }
 0x303   : > { %v3365_v34 = vadd.f32 %v4496_v42, %v5950_v14  ;;  %v3356_v17 = vpop.f32.mrb[55].mxu1 }
 0x304   : > { %v3357_v15 = vadd.f32 %v5950_v14, %v3356_v17 }
 0x305   : > { %v3958_v29 = vpack.c.bf16 %v3365_v34, %v3362_v6 }
 0x306   : > { %v3953_v11 = vpack.c.bf16 %v3357_v15, %v3354_v41 }
 0x307   : > { %3990 = vst [vmem:[%s5958_s26 + $0x58] sm:$0xff] %v3958_v29  }
 0x308   : > { %3989 = vst [vmem:[%s5958_s26 + $0x50] sm:$0xff] %v3953_v11   ;;  %v4499_v23 = vpop.f32.mrb[56].mxu1 }
 0x309   : > { %v3369_v54 = vpop.f32.mrb[57].mxu1  ;;  %v3378_v16 = vadd.f32 %v4499_v23, %v5950_v14 }
 0x30a   : > { %v4500_v20 = vpop.f32.mrb[58].mxu1  ;;  %v3370_v60 = vadd.f32 %v5950_v14, %v3369_v54 }
 0x30b   : > { %v3381_v36 = vadd.f32 %v4500_v20, %v5950_v14  ;;  %v3372_v12 = vpop.f32.mrb[59].mxu1 }
 0x30c   : > { %v3373_v10 = vadd.f32 %v5950_v14, %v3372_v12 }
 0x30d   : > { %v3968_v31 = vpack.c.bf16 %v3381_v36, %v3378_v16 }
 0x30e   : > { %v3963_v52 = vpack.c.bf16 %v3373_v10, %v3370_v60 }
 0x30f   : > { %3992 = vst [vmem:[%s5958_s26 + $0x68] sm:$0xff] %v3968_v31  }
 0x310   : > { %3991 = vst [vmem:[%s5958_s26 + $0x60] sm:$0xff] %v3963_v52   ;;  %v4503_v27 = vpop.f32.mrb[60].mxu1 }
 0x311   : > { %v3385_v62 = vpop.f32.mrb[61].mxu1  ;;  %v3394_v51 = vadd.f32 %v4503_v27, %v5950_v14 }
 0x312   : > { %v4504_v58 = vpop.f32.mrb[62].mxu1  ;;  %v3386_v32 = vadd.f32 %v5950_v14, %v3385_v62 }
 0x313   : > { %v3397_v24 = vadd.f32 %v4504_v58, %v5950_v14  ;;  %v3388_v50 = vpop.f32.mrb[63].mxu1 }
 0x314   : > { %v3389_v13 = vadd.f32 %v5950_v14, %v3388_v50 }
 0x315   : > { %v3978_v35 = vpack.c.bf16 %v3397_v24, %v3394_v51 }
 0x316   : > { %v3973_v30 = vpack.c.bf16 %v3389_v13, %v3386_v32 }
 0x317   : > { %3994 = vst [vmem:[%s5958_s26 + $0x78] sm:$0xff] %v3978_v35  }
 0x318   : > { %3993 = vst [vmem:[%s5958_s26 + $0x70] sm:$0xff] %v3973_v30  }
 0x319   : > { %4842 = shalt.err (!%p4839_p3)
}
 0x31a   : > { %s4843_s14 = scalar_lea.hbm %s6007_s9, 2048  ;;  %s4847_s17 = scalar_lea.hbm %s6061_s5, 4096 }
 0x31b   : > { %p4844_p4 = scmp.ne.s32.totalorder %s6007_s9, %s4843_s14  ;;  %p4848_p9 = scmp.lt.u32.totalorder %s6007_s9, %s6061_s5 }
 0x31c   : > { %p4849_p10 = scmp.lt.u32.totalorder %s4847_s17, %s4843_s14  ;;  %p4851_p12 = scmp.lt.u32.totalorder %s4843_s14, %s6007_s9 }
 0x31d   : > { %p4845_p7 = pnand %p4844_p4, %p4965_p5 }
 0x31e   : > { %p4850_p11 = por %p4849_p10, %p4848_p9 }
 0x31f   : > { %p4846_p8 = pneg %p4845_p7 }
 0x320   : > { %p4852_p13 = por %p4851_p12, %p4850_p11 }
 0x322   : > { %p4853_p0 = pnand %p4852_p13, %p4846_p8 }
 0x324   : > { %4856 = shalt.err (!%p4853_p0)
}
 0x325   : > { %s4895_s26 = smov 64   ;;  %s4896_s30 = smov 4  }
 0x326   : > { %4771 = dma.vmem_to_hbm [thread:$0]  (%p4965_p5), %s6009_s6, 2048, %s6007_s9, %s6015_s22, %s4895_s26, %s4895_s26, %s4896_s30  }
 0x327 PF: > { %p4777_p1 = scmp.ge.s32.totalorder %s4891_s21, 2  ;;  %s3589_s7 = sand.u32 1, %s4879_s18  }
 0x328   : > { %s3590_s8 = scalar_lea.sflag [#allocation4], %s3589_s7 }
 0x329   : > { %p4774_p2 = pnand %p4777_p1, %p4969_p6 }
 0x32b   : > { %4874 = dma.done.wait (!%p4774_p2), %s3590_s8, 2048  }
 0x32c   : > { %4876 = vsyncadd (!%p4774_p2), %s3590_s8, 4294965248  ;;  %p15_p3 = scmp.ge.s32.totalorder %s4952_s24, 4   ;;  %s6076_s18 = smov %s4883_s19 }
 0x32d   : > { %s6077_s19 = smov %s4887_s20  ;;  %s6078_s20 = smov %s4963_s27 }
 0x32e   : > { %s6079_s21 = smov %s4952_s24  ;;  %17 = sbr.rel (!%p15_p3) target bundleno = 3 (0x3), region = 94 }
 0x335   :  { %3595 = vsyncpa [#allocation4], 1 }
 0x336   :  { %3597 = vsyncpa [#allocation4 + $0x1], 1 }

</bundles_post_ra>
